<compile_context>
chip_gen: v6e
topology: v6e:2x2x1
jax: 0.10.0
libtpu: 0.0.40
codegen_flags: <defaults>
</compile_context>

<pallas_src>
import functools

import jax
import jax.numpy as jnp
from jax.experimental import pallas as pl
from jax.experimental.pallas import tpu as pltpu

EPS = 1e-5                      # nn.BatchNorm2d default eps
_INV_SQRT2 = 0.7071067811865476


def _round_up(x, m):
    return ((x + m - 1) // m) * m


def _tpu_gen():
    try:
        kind = jax.devices()[0].device_kind.lower()
    except Exception:
        return 0
    if "v5" in kind:
        return 5
    if "v6" in kind:
        return 6
    if "v7" in kind or "7x" in kind or "tpu7" in kind:
        return 7
    return 0


_GEN = _tpu_gen()
# Generation-aware knobs (128 MiB physical VMEM on v5e/v6e, 64 MiB on v7x).
VMEM_LIMIT = {5: 100 * 2**20, 6: 96 * 2**20, 7: 52 * 2**20}.get(_GEN, 48 * 2**20)
TOKEN_TILE = {5: 1024, 6: 1024, 7: 512}.get(_GEN, 512)
MXU_K = 128 if _GEN == 5 else 256          # embed GEMM K padded to MXU depth
USE_BF16_EW = _GEN in (6, 7)               # bf16 VALU only on v6e / v7x


def _gelu(x):
    # Exact erf GELU (matches nn.GELU() default).
    return 0.5 * x * (1.0 + jax.lax.erf(x * _INV_SQRT2))


def _mosaic(dim_sem):
    return pltpu.CompilerParams(dimension_semantics=dim_sem,
                                vmem_limit_bytes=VMEM_LIMIT)


def _const_spec(block_shape):
    # Grid-constant operand of a 1-D grid (same block every step).
    return pl.BlockSpec(block_shape, lambda i, _n=len(block_shape): (0,) * _n)


def _pick_tile(m, cap):
    """Largest row tile <= cap dividing m (prefer multiples of 8) so the
    fused per-tile BN statistics cover equal-sized, fully valid tiles."""
    if m <= cap:
        return m
    for t in range(cap - cap % 8, 7, -8):
        if m % t == 0:
            return t
    for t in range(cap, 0, -1):
        if m % t == 0:
            return t
    return m


def _stats_to_affine(stats, rows_per_tile, gamma, beta):
    """Combine per-tile (mean, M2) stats with Chan's equal-size formula and
    fold the BN affine so that bn(x) == x * scale + shift (train-mode BN,
    biased variance).  Tiny XLA reduction over (tiles, C) only."""
    tmean = stats[:, 0, :]                                    # (G, C)
    tm2 = stats[:, 1, :]                                      # (G, C)
    g = stats.shape[0]
    mean = jnp.mean(tmean, axis=0, keepdims=True)             # (1, C)
    m2 = (jnp.sum(tm2, axis=0, keepdims=True)
          + rows_per_tile * jnp.sum(jnp.square(tmean - mean), axis=0,
                                    keepdims=True))
    var = m2 / float(rows_per_tile * g)
    scale = gamma * jax.lax.rsqrt(var + EPS)
    shift = beta - mean * scale
    return scale, shift


# ---------------------------------------------------------------------------
# Pallas kernels
# ---------------------------------------------------------------------------
def embed_kernel(xp_ref, w_ref, b_ref, o_ref, stat_ref):
    # xp_ref: (TM, KP) bf16 patch rows (K zero-padded to the MXU depth)
    # w_ref : (KP, C) bf16;  b_ref: (1, C) f32
    y = jnp.dot(xp_ref[...], w_ref[...], preferred_element_type=jnp.float32)
    y = _gelu(y + b_ref[...])                       # pre-BN activation (f32)
    o_ref[...] = y.astype(o_ref.dtype)              # bf16 to HBM
    mean = jnp.mean(y, axis=0, keepdims=True)       # fused per-tile BN stats
    m2 = jnp.sum(jnp.square(y - mean), axis=0, keepdims=True)
    stat_ref[0] = jnp.concatenate([mean, m2], axis=0)


def dw_kernel(x_ref, sc_ref, sh_ref, wm_ref, b_ref, o_ref, stat_ref, pad_ref,
              *, k, h, w, c, pad_lo):
    # x_ref : (1, H, W, C) bf16 layer input (pre-BN act of previous stage)
    # sc/sh : (1, C) f32 folded BN of the previous stage (applied lazily here)
    # wm_ref: (k*k, W, C) f32 taps pre-multiplied by the W-border mask
    # pad_ref: (H+k-1, W, C) f32 scratch -- 'same' padding along H only (the
    #          free axis); W handled by XLU roll + masked taps.
    xn = x_ref[0].astype(jnp.float32) * sc_ref[...] + sh_ref[...]   # (H, W, C)
    # Only the border rows are zeroed (interior is fully overwritten each
    # step); re-zeroed every step so the batch grid axis stays "parallel".
    if pad_lo > 0:
        pad_ref[0:pad_lo, :, :] = jnp.zeros((pad_lo, w, c), jnp.float32)
    if k - 1 - pad_lo > 0:
        pad_ref[pad_lo + h:h + k - 1, :, :] = jnp.zeros(
            (k - 1 - pad_lo, w, c), jnp.float32)
    pad_ref[pad_lo:pad_lo + h, :, :] = xn           # free-axis offset store

    acc = jnp.zeros((h, w, c), jnp.float32)
    for dh in range(k):                             # static tap loop
        window = pad_ref[dh:dh + h, :, :]           # one load per dh
        for dw_i in range(k):
            s = dw_i - pad_lo                       # W shift of this tap
            shifted = window if s % w == 0 else pltpu.roll(window, (-s) % w,
                                                           axis=1)
            acc = acc + shifted * wm_ref[dh * k + dw_i]     # mask folded in w
    y = _gelu(acc + b_ref[...])                     # pre-BN1 activation (f32)
    o_ref[0] = y.astype(o_ref.dtype)
    mean = jnp.mean(y, axis=(0, 1), keepdims=True)  # fused per-plane BN stats
    m2 = jnp.sum(jnp.square(y - mean), axis=(0, 1), keepdims=True)
    stat_ref[0] = jnp.concatenate([mean[0], m2[0]], axis=0)


def pw_kernel(x_ref, sc_in_ref, sh_in_ref, a_ref, sc1_ref, sh1_ref,
              w_ref, b_ref, o_ref, stat_ref, *, ew_dtype):
    # x_ref/a_ref: (TM, C) bf16;  w_ref: (C, C) bf16.
    # BN(prev stage) + BN1 + residual fused; epilogue dtype is generation-
    # dependent (bf16 on v6e/v7x where the kernel is VALU-bound, f32 on v5e).
    xn = (x_ref[...].astype(ew_dtype) * sc_in_ref[...].astype(ew_dtype)
          + sh_in_ref[...].astype(ew_dtype))
    t = (a_ref[...].astype(ew_dtype) * sc1_ref[...].astype(ew_dtype)
         + sh1_ref[...].astype(ew_dtype) + xn)
    y = jnp.dot(t.astype(jnp.bfloat16), w_ref[...],
                preferred_element_type=jnp.float32)
    y = _gelu(y + b_ref[...])                       # pre-BN2 activation (f32)
    o_ref[...] = y.astype(o_ref.dtype)
    mean = jnp.mean(y, axis=0, keepdims=True)
    m2 = jnp.sum(jnp.square(y - mean), axis=0, keepdims=True)
    stat_ref[0] = jnp.concatenate([mean, m2], axis=0)


def head_kernel(f_ref, sc_ref, sh_ref, w_ref, b_ref, o_ref):
    # f_ref: (NB, H*W, C) bf16 pre-BN2 features; the per-channel BN affine
    # commutes with the spatial mean, so pool -> scale/shift -> matmul.
    pooled = jnp.mean(f_ref[...].astype(jnp.float32), axis=1)        # (NB, C)
    pooled = pooled * sc_ref[...] + sh_ref[...]
    o_ref[...] = jnp.dot(pooled.astype(jnp.bfloat16), w_ref[...],
                         preferred_element_type=jnp.float32) + b_ref[...]


# ---------------------------------------------------------------------------
# pallas_call plumbing
# ---------------------------------------------------------------------------
def _embed_call(patches, w_bf16, b, tm):
    m, kp = patches.shape
    c = w_bf16.shape[1]
    g = pl.cdiv(m, tm)
    return pl.pallas_call(
        embed_kernel,
        out_shape=(jax.ShapeDtypeStruct((m, c), jnp.bfloat16),
                   jax.ShapeDtypeStruct((g, 2, c), jnp.float32)),
        grid=(g,),
        in_specs=[pl.BlockSpec((tm, kp), lambda i: (i, 0)),
                  _const_spec((kp, c)),
                  _const_spec((1, c))],
        out_specs=(pl.BlockSpec((tm, c), lambda i: (i, 0)),
                   pl.BlockSpec((1, 2, c), lambda i: (i, 0, 0))),
        compiler_params=_mosaic(("parallel",)),
        cost_estimate=pl.CostEstimate(
            flops=2 * m * kp * c, transcendentals=m * c,
            bytes_accessed=2 * (m * kp + m * c + kp * c)),
    )(patches, w_bf16, b)


def _dw_call(x4d, sc_in, sh_in, wm_kwc, b, *, k, pad_lo):
    n, h, w, c = x4d.shape
    kern = functools.partial(dw_kernel, k=k, h=h, w=w, c=c, pad_lo=pad_lo)
    return pl.pallas_call(
        kern,
        out_shape=(jax.ShapeDtypeStruct((n, h, w, c), jnp.bfloat16),
                   jax.ShapeDtypeStruct((n, 2, c), jnp.float32)),
        grid=(n,),
        in_specs=[pl.BlockSpec((1, h, w, c), lambda i: (i, 0, 0, 0)),
                  _const_spec((1, c)),
                  _const_spec((1, c)),
                  _const_spec((k * k, w, c)),
                  _const_spec((1, c))],
        out_specs=(pl.BlockSpec((1, h, w, c), lambda i: (i, 0, 0, 0)),
                   pl.BlockSpec((1, 2, c), lambda i: (i, 0, 0))),
        scratch_shapes=[pltpu.VMEM((h + k - 1, w, c), jnp.float32)],
        compiler_params=_mosaic(("parallel",)),
        cost_estimate=pl.CostEstimate(
            flops=2 * n * h * w * c * k * k, transcendentals=n * h * w * c,
            bytes_accessed=2 * 2 * n * h * w * c),
    )(x4d, sc_in, sh_in, wm_kwc, b)


def _pw_call(x2d, sc_in, sh_in, a2d, sc1, sh1, w_bf16, b, tm):
    m, c = x2d.shape
    g = pl.cdiv(m, tm)
    kern = functools.partial(
        pw_kernel, ew_dtype=jnp.bfloat16 if USE_BF16_EW else jnp.float32)
    row = lambda i: (i, 0)
    return pl.pallas_call(
        kern,
        out_shape=(jax.ShapeDtypeStruct((m, c), jnp.bfloat16),
                   jax.ShapeDtypeStruct((g, 2, c), jnp.float32)),
        grid=(g,),
        in_specs=[pl.BlockSpec((tm, c), row),
                  _const_spec((1, c)), _const_spec((1, c)),
                  pl.BlockSpec((tm, c), row),
                  _const_spec((1, c)), _const_spec((1, c)),
                  _const_spec((c, c)), _const_spec((1, c))],
        out_specs=(pl.BlockSpec((tm, c), row),
                   pl.BlockSpec((1, 2, c), lambda i: (i, 0, 0))),
        compiler_params=_mosaic(("parallel",)),
        cost_estimate=pl.CostEstimate(
            flops=2 * m * c * c, transcendentals=m * c,
            bytes_accessed=2 * (3 * m * c + c * c)),
    )(x2d, sc_in, sh_in, a2d, sc1, sh1, w_bf16, b)


def _head_call(f3d, sc, sh, w_bf16, b):
    n, hw, c = f3d.shape
    ncls = w_bf16.shape[1]
    nb = n if n <= 8 else 8
    return pl.pallas_call(
        head_kernel,
        out_shape=jax.ShapeDtypeStruct((n, ncls), jnp.float32),
        grid=(pl.cdiv(n, nb),),
        in_specs=[pl.BlockSpec((nb, hw, c), lambda i: (i, 0, 0)),
                  _const_spec((1, c)), _const_spec((1, c)),
                  _const_spec((c, ncls)), _const_spec((1, ncls))],
        out_specs=pl.BlockSpec((nb, ncls), lambda i: (i, 0)),
        compiler_params=_mosaic(("parallel",)),
    )(f3d, sc, sh, w_bf16, b)


# ---------------------------------------------------------------------------
# Parameter init (deterministic, PyTorch-like layouts converted for kernels)
# ---------------------------------------------------------------------------
def init_params(key, hidden_dim, kernel_size, patch_size, num_layers,
                num_classes):
    c, k, p = hidden_dim, kernel_size, patch_size
    kp = p * p * 3
    kp_pad = _round_up(kp, MXU_K)                  # pad embed K to MXU depth
    keys = iter(jax.random.split(key, 2 + 4 * num_layers + 2))

    def unif(shape, fan_in):
        bound = 1.0 / float(fan_in) ** 0.5
        return jax.random.uniform(next(keys), shape, jnp.float32, -bound, bound)

    we = unif((c, 3, p, p), 3 * p * p)                        # torch Conv2d layout
    w_embed = jnp.transpose(we, (2, 3, 1, 0)).reshape(kp, c)
    w_embed = jnp.pad(w_embed, ((0, kp_pad - kp), (0, 0)))
    params = dict(
        w_embed=w_embed.astype(jnp.bfloat16),                 # (KP_pad, C)
        b_embed=unif((c,), 3 * p * p).reshape(1, c),
        g_e=jnp.ones((1, c), jnp.float32),
        bt_e=jnp.zeros((1, c), jnp.float32),
        layers=[],
    )
    for _ in range(num_layers):
        wdw = unif((c, 1, k, k), k * k)                       # depthwise weight
        bdw = unif((c,), k * k)
        wpw = unif((c, c, 1, 1), c)                           # pointwise weight
        bpw = unif((c,), c)
        params['layers'].append(dict(
            w_dw=jnp.transpose(wdw[:, 0], (1, 2, 0)).reshape(k * k, c),
            b_dw=bdw.reshape(1, c),
            g1=jnp.ones((1, c), jnp.float32),
            bt1=jnp.zeros((1, c), jnp.float32),
            w_pw=jnp.transpose(wpw[:, :, 0, 0]).astype(jnp.bfloat16),   # (Cin, Cout)
            b_pw=bpw.reshape(1, c),
            g2=jnp.ones((1, c), jnp.float32),
            bt2=jnp.zeros((1, c), jnp.float32),
        ))
    wfc = unif((num_classes, c), c)                           # torch Linear layout
    params['w_fc'] = jnp.transpose(wfc).astype(jnp.bfloat16)  # (C, num_classes)
    params['b_fc'] = unif((num_classes,), c).reshape(1, num_classes)
    return params


# ---------------------------------------------------------------------------
# Forward pass
# ---------------------------------------------------------------------------
def convmixer_forward(x_nchw, params, hidden_dim, kernel_size, patch_size,
                      num_layers):
    n, cin, hi, wi = x_nchw.shape
    p = patch_size
    ho, wo = hi // p, wi // p
    c = hidden_dim
    m = n * ho * wo
    k = kernel_size
    pad_lo = (k - 1) // 2        # torch 'same': left/top pad; right/bot = k-1-pad_lo
    tm = _pick_tile(m, TOKEN_TILE)

    # --- embed: non-overlapping patch extraction (glue) + tiled MXU matmul
    x = jnp.transpose(x_nchw, (0, 2, 3, 1))                   # NHWC
    patches = (x.reshape(n, ho, p, wo, p, cin)
                 .transpose(0, 1, 3, 2, 4, 5)
                 .reshape(m, p * p * cin))                    # rows = (n, ho, wo)
    kp = p * p * cin
    kp_pad = params['w_embed'].shape[0]
    if kp_pad > kp:
        patches = jnp.pad(patches, ((0, 0), (0, kp_pad - kp)))
    patches = patches.astype(jnp.bfloat16)

    act, stats = _embed_call(patches, params['w_embed'], params['b_embed'], tm)
    scale, shift = _stats_to_affine(stats, tm, params['g_e'], params['bt_e'])

    # Static W-border ('same'-padding) masks, folded into the depthwise taps.
    col = jnp.arange(wo)
    wmask = jnp.stack(
        [((col + (dw - pad_lo) >= 0) & (col + (dw - pad_lo) < wo))
         for dh in range(k) for dw in range(k)], axis=0).astype(jnp.float32)

    # --- mixer layers: BN of the previous stage is applied lazily inside the
    #     next kernels via the folded (scale, shift) pair.
    for lp in params['layers']:
        wm = wmask[:, :, None] * lp['w_dw'][:, None, :]       # (k*k, W, C)
        x4d = act.reshape(n, ho, wo, c)                       # free reshape
        a1, stats1 = _dw_call(x4d, scale, shift, wm, lp['b_dw'],
                              k=k, pad_lo=pad_lo)             # pre-BN1, bf16
        scale1, shift1 = _stats_to_affine(stats1, ho * wo, lp['g1'], lp['bt1'])
        act, stats2 = _pw_call(act, scale, shift, a1.reshape(m, c),
                               scale1, shift1, lp['w_pw'], lp['b_pw'], tm)
        scale, shift = _stats_to_affine(stats2, tm, lp['g2'], lp['bt2'])

    # --- head: global average pool (with folded last BN) + linear
    f3d = act.reshape(n, ho * wo, c)
    return _head_call(f3d, scale, shift, params['w_fc'], params['b_fc'])


if __name__ == "__main__":
    hidden_dim, kernel_size, patch_size = 32, 3, 2
    num_layers, num_classes = 2, 10

    key = jax.random.PRNGKey(0)
    kx, kp = jax.random.split(key)
    x = jax.random.normal(kx, (2, 3, 16, 16), jnp.float32)    # NCHW, like PyTorch
    params = init_params(kp, hidden_dim, kernel_size, patch_size,
                         num_layers, num_classes)

    fwd = jax.jit(functools.partial(convmixer_forward,
                                    hidden_dim=hidden_dim,
                                    kernel_size=kernel_size,
                                    patch_size=patch_size,
                                    num_layers=num_layers))
    logits = fwd(x, params)
    logits = jax.block_until_ready(logits)
    assert logits.shape == (2, num_classes)
    assert bool(jnp.all(jnp.isfinite(logits)))
    print("KERNEL_OK")
</pallas_src>

<mosaic_0001>
module attributes {stable_mosaic.version = 11 : i64} {
  func.func @embed_kernel(%arg0: i32, %arg1: memref<128x256xbf16, #tpu.memory_space<vmem>>, %arg2: memref<256x32xbf16, #tpu.memory_space<vmem>>, %arg3: memref<1x32xf32, #tpu.memory_space<vmem>>, %arg4: memref<128x32xbf16, #tpu.memory_space<vmem>>, %arg5: memref<1x2x32xf32, #tpu.memory_space<vmem>>) attributes {dimension_semantics = [#tpu.dimension_semantics<parallel>], iteration_bounds = array<i64: 1>, scalar_prefetch = 0 : i64, scratch_operands = 0 : i64, tpu.core_type = #tpu.core_type<tc>, window_params = [{transform_indices = @transform_0, window_bounds = array<i64: 128, 256>}, {pipeline_mode = #tpu.pipeline_mode<synchronous>, transform_indices = @transform_1, window_bounds = array<i64: 256, 32>}, {pipeline_mode = #tpu.pipeline_mode<synchronous>, transform_indices = @transform_2, window_bounds = array<i64: 1, 32>}, {transform_indices = @transform_3, window_bounds = array<i64: 128, 32>}, {transform_indices = @transform_4, window_bounds = array<i64: 1, 2, 32>}]} {
    %c0 = arith.constant 0 : index
    %c0_0 = arith.constant 0 : index
    %0 = vector.load %arg1[%c0, %c0_0] : memref<128x256xbf16, #tpu.memory_space<vmem>>, vector<128x256xbf16>
    %c0_1 = arith.constant 0 : index
    %c0_2 = arith.constant 0 : index
    %1 = vector.load %arg2[%c0_1, %c0_2] : memref<256x32xbf16, #tpu.memory_space<vmem>>, vector<256x32xbf16>
    %cst = arith.constant dense<0.000000e+00> : vector<128x32xf32>
    %2 = tpu.matmul %0, %1, %cst {dimension_numbers = #tpu.dot_dimension_numbers<[1], [0], [0], [1], [0, 0, 1, 1], [], []>} : vector<128x256xbf16>, vector<256x32xbf16>, vector<128x32xf32> -> vector<128x32xf32>
    %c0_3 = arith.constant 0 : index
    %c0_4 = arith.constant 0 : index
    %3 = vector.load %arg3[%c0_3, %c0_4] : memref<1x32xf32, #tpu.memory_space<vmem>>, vector<1x32xf32>
    %4 = vector.broadcast %3 : vector<1x32xf32> to vector<128x32xf32>
    %5 = arith.addf %2, %4 : vector<128x32xf32>
    %cst_5 = arith.constant 5.000000e-01 : f32
    %6 = vector.broadcast %cst_5 : f32 to vector<128x32xf32>
    %7 = arith.mulf %6, %5 : vector<128x32xf32>
    %cst_6 = arith.constant 0.707106769 : f32
    %8 = vector.broadcast %cst_6 : f32 to vector<128x32xf32>
    %9 = arith.mulf %5, %8 : vector<128x32xf32>
    %10 = math.erf %9 : vector<128x32xf32>
    %cst_7 = arith.constant 1.000000e+00 : f32
    %11 = vector.broadcast %cst_7 : f32 to vector<128x32xf32>
    %12 = arith.addf %11, %10 : vector<128x32xf32>
    %13 = arith.mulf %7, %12 : vector<128x32xf32>
    %14 = arith.truncf %13 : vector<128x32xf32> to vector<128x32xbf16>
    %c0_8 = arith.constant 0 : index
    %c0_9 = arith.constant 0 : index
    %15 = vector.load %arg4[%c0_8, %c0_9] : memref<128x32xbf16, #tpu.memory_space<vmem>>, vector<128x32xbf16>
    tpu.vector_store %arg4[%c0_8, %c0_9], %14 {strides = array<i32>} : memref<128x32xbf16, #tpu.memory_space<vmem>>, vector<128x32xbf16>,
    %cst_10 = arith.constant dense<0.000000e+00> : vector<32xf32>
    %16 = vector.multi_reduction <add>, %13, %cst_10 [0] : vector<128x32xf32> to vector<32xf32>
    %17 = vector.shape_cast %16 : vector<32xf32> to vector<1x32xf32>
    %cst_11 = arith.constant 1.280000e+02 : f32
    %18 = vector.broadcast %cst_11 : f32 to vector<1x32xf32>
    %19 = arith.divf %17, %18 : vector<1x32xf32>
    %20 = vector.broadcast %19 : vector<1x32xf32> to vector<128x32xf32>
    %21 = arith.subf %13, %20 : vector<128x32xf32>
    %22 = arith.mulf %21, %21 : vector<128x32xf32>
    %cst_12 = arith.constant dense<0.000000e+00> : vector<32xf32>
    %23 = vector.multi_reduction <add>, %22, %cst_12 [0] : vector<128x32xf32> to vector<32xf32>
    %24 = vector.shape_cast %23 : vector<32xf32> to vector<1x32xf32>
    %25 = tpu.concatenate %19, %24 in 0 : vector<1x32xf32>, vector<1x32xf32> -> vector<2x32xf32>
    %c0_13 = arith.constant 0 : index
    %c0_14 = arith.constant 0 : index
    %c0_15 = arith.constant 0 : index
    %26 = vector.load %arg5[%c0_13, %c0_14, %c0_15] : memref<1x2x32xf32, #tpu.memory_space<vmem>>, vector<1x2x32xf32>
    %27 = vector.shape_cast %26 : vector<1x2x32xf32> to vector<2x32xf32>
    %28 = vector.shape_cast %25 : vector<2x32xf32> to vector<1x2x32xf32>
    tpu.vector_store %arg5[%c0_13, %c0_14, %c0_15], %28 {strides = array<i32>} : memref<1x2x32xf32, #tpu.memory_space<vmem>>, vector<1x2x32xf32>,
    return
  }
  func.func @transform_0(%arg0: i32) -> (i32, i32) {
    %c0_i32 = arith.constant 0 : i32
    %c0_i32_0 = arith.constant 0 : i32
    return %arg0, %c0_i32 : i32, i32
  }
  func.func @transform_1(%arg0: i32) -> (i32, i32) {
    %c0_i32 = arith.constant 0 : i32
    %c0_i32_0 = arith.constant 0 : i32
    %c0_i32_1 = arith.constant 0 : i32
    return %c0_i32, %c0_i32_0 : i32, i32
  }
  func.func @transform_2(%arg0: i32) -> (i32, i32) {
    %c0_i32 = arith.constant 0 : i32
    %c0_i32_0 = arith.constant 0 : i32
    %c0_i32_1 = arith.constant 0 : i32
    return %c0_i32, %c0_i32_0 : i32, i32
  }
  func.func @transform_3(%arg0: i32) -> (i32, i32) {
    %c0_i32 = arith.constant 0 : i32
    %c0_i32_0 = arith.constant 0 : i32
    return %arg0, %c0_i32 : i32, i32
  }
  func.func @transform_4(%arg0: i32) -> (i32, i32, i32) {
    %c0_i32 = arith.constant 0 : i32
    %c0_i32_0 = arith.constant 0 : i32
    %c0_i32_1 = arith.constant 0 : i32
    return %arg0, %c0_i32, %c0_i32_0 : i32, i32, i32
  }
}

module attributes {stable_mosaic.version = 11 : i64} {
  func.func @dw_kernel(%arg0: i32, %arg1: memref<1x8x8x32xbf16, #tpu.memory_space<vmem>>, %arg2: memref<1x32xf32, #tpu.memory_space<vmem>>, %arg3: memref<1x32xf32, #tpu.memory_space<vmem>>, %arg4: memref<9x8x32xf32, #tpu.memory_space<vmem>>, %arg5: memref<1x32xf32, #tpu.memory_space<vmem>>, %arg6: memref<1x8x8x32xbf16, #tpu.memory_space<vmem>>, %arg7: memref<1x2x32xf32, #tpu.memory_space<vmem>>, %arg8: memref<10x8x32xf32, #tpu.memory_space<vmem>>) attributes {dimension_semantics = [#tpu.dimension_semantics<parallel>], iteration_bounds = array<i64: 2>, scalar_prefetch = 0 : i64, scratch_operands = 1 : i64, tpu.core_type = #tpu.core_type<tc>, window_params = [{transform_indices = @transform_0, window_bounds = array<i64: 1, 8, 8, 32>}, {pipeline_mode = #tpu.pipeline_mode<synchronous>, transform_indices = @transform_1, window_bounds = array<i64: 1, 32>}, {pipeline_mode = #tpu.pipeline_mode<synchronous>, transform_indices = @transform_2, window_bounds = array<i64: 1, 32>}, {pipeline_mode = #tpu.pipeline_mode<synchronous>, transform_indices = @transform_3, window_bounds = array<i64: 9, 8, 32>}, {pipeline_mode = #tpu.pipeline_mode<synchronous>, transform_indices = @transform_4, window_bounds = array<i64: 1, 32>}, {transform_indices = @transform_5, window_bounds = array<i64: 1, 8, 8, 32>}, {transform_indices = @transform_6, window_bounds = array<i64: 1, 2, 32>}]} {
    %c0 = arith.constant 0 : index
    %c0_0 = arith.constant 0 : index
    %c0_1 = arith.constant 0 : index
    %c0_2 = arith.constant 0 : index
    %0 = vector.load %arg1[%c0, %c0_0, %c0_1, %c0_2] : memref<1x8x8x32xbf16, #tpu.memory_space<vmem>>, vector<1x8x8x32xbf16>
    %1 = vector.shape_cast %0 : vector<1x8x8x32xbf16> to vector<8x8x32xbf16>
    %2 = arith.extf %1 : vector<8x8x32xbf16> to vector<8x8x32xf32>
    %c0_3 = arith.constant 0 : index
    %c0_4 = arith.constant 0 : index
    %3 = vector.load %arg2[%c0_3, %c0_4] : memref<1x32xf32, #tpu.memory_space<vmem>>, vector<1x32xf32>
    %4 = vector.shape_cast %3 : vector<1x32xf32> to vector<1x1x32xf32>
    %5 = vector.broadcast %4 : vector<1x1x32xf32> to vector<8x8x32xf32>
    %6 = arith.mulf %2, %5 : vector<8x8x32xf32>
    %c0_5 = arith.constant 0 : index
    %c0_6 = arith.constant 0 : index
    %7 = vector.load %arg3[%c0_5, %c0_6] : memref<1x32xf32, #tpu.memory_space<vmem>>, vector<1x32xf32>
    %8 = vector.shape_cast %7 : vector<1x32xf32> to vector<1x1x32xf32>
    %9 = vector.broadcast %8 : vector<1x1x32xf32> to vector<8x8x32xf32>
    %10 = arith.addf %6, %9 : vector<8x8x32xf32>
    %cst = arith.constant 0.000000e+00 : f32
    %11 = vector.broadcast %cst : f32 to vector<1x8x32xf32>
    %c0_7 = arith.constant 0 : index
    %c0_8 = arith.constant 0 : index
    %c0_9 = arith.constant 0 : index
    %12 = vector.load %arg8[%c0_7, %c0_8, %c0_9] : memref<10x8x32xf32, #tpu.memory_space<vmem>>, vector<1x8x32xf32>
    tpu.vector_store %arg8[%c0_7, %c0_8, %c0_9], %11 {strides = array<i32>} : memref<10x8x32xf32, #tpu.memory_space<vmem>>, vector<1x8x32xf32>,
    %cst_10 = arith.constant 0.000000e+00 : f32
    %13 = vector.broadcast %cst_10 : f32 to vector<1x8x32xf32>
    %c9 = arith.constant 9 : index
    %c0_11 = arith.constant 0 : index
    %c0_12 = arith.constant 0 : index
    %14 = vector.load %arg8[%c9, %c0_11, %c0_12] : memref<10x8x32xf32, #tpu.memory_space<vmem>>, vector<1x8x32xf32>
    tpu.vector_store %arg8[%c9, %c0_11, %c0_12], %13 {strides = array<i32>} : memref<10x8x32xf32, #tpu.memory_space<vmem>>, vector<1x8x32xf32>,
    %c1 = arith.constant 1 : index
    %c0_13 = arith.constant 0 : index
    %c0_14 = arith.constant 0 : index
    %15 = vector.load %arg8[%c1, %c0_13, %c0_14] : memref<10x8x32xf32, #tpu.memory_space<vmem>>, vector<8x8x32xf32>
    tpu.vector_store %arg8[%c1, %c0_13, %c0_14], %10 {strides = array<i32>} : memref<10x8x32xf32, #tpu.memory_space<vmem>>, vector<8x8x32xf32>,
    %cst_15 = arith.constant 0.000000e+00 : f32
    %16 = vector.broadcast %cst_15 : f32 to vector<8x8x32xf32>
    %c0_16 = arith.constant 0 : index
    %c0_17 = arith.constant 0 : index
    %c0_18 = arith.constant 0 : index
    %17 = vector.load %arg8[%c0_16, %c0_17, %c0_18] : memref<10x8x32xf32, #tpu.memory_space<vmem>>, vector<8x8x32xf32>
    %c1_i32 = arith.constant 1 : i32
    %18 = tpu.dynamic_rotate %17 by %c1_i32 dim 1 : vector<8x8x32xf32>, i32 -> vector<8x8x32xf32>
    %c0_19 = arith.constant 0 : index
    %c0_20 = arith.constant 0 : index
    %c0_21 = arith.constant 0 : index
    %19 = vector.load %arg4[%c0_19, %c0_20, %c0_21] : memref<9x8x32xf32, #tpu.memory_space<vmem>>, vector<1x8x32xf32>
    %20 = vector.shape_cast %19 : vector<1x8x32xf32> to vector<8x32xf32>
    %21 = vector.shape_cast %20 : vector<8x32xf32> to vector<1x8x32xf32>
    %22 = vector.broadcast %21 : vector<1x8x32xf32> to vector<8x8x32xf32>
    %23 = arith.mulf %18, %22 : vector<8x8x32xf32>
    %24 = arith.addf %16, %23 : vector<8x8x32xf32>
    %c1_22 = arith.constant 1 : index
    %c0_23 = arith.constant 0 : index
    %c0_24 = arith.constant 0 : index
    %25 = vector.load %arg4[%c1_22, %c0_23, %c0_24] : memref<9x8x32xf32, #tpu.memory_space<vmem>>, vector<1x8x32xf32>
    %26 = vector.shape_cast %25 : vector<1x8x32xf32> to vector<8x32xf32>
    %27 = vector.shape_cast %26 : vector<8x32xf32> to vector<1x8x32xf32>
    %28 = vector.broadcast %27 : vector<1x8x32xf32> to vector<8x8x32xf32>
    %29 = arith.mulf %17, %28 : vector<8x8x32xf32>
    %30 = arith.addf %24, %29 : vector<8x8x32xf32>
    %c7_i32 = arith.constant 7 : i32
    %31 = tpu.dynamic_rotate %17 by %c7_i32 dim 1 : vector<8x8x32xf32>, i32 -> vector<8x8x32xf32>
    %c2 = arith.constant 2 : index
    %c0_25 = arith.constant 0 : index
    %c0_26 = arith.constant 0 : index
    %32 = vector.load %arg4[%c2, %c0_25, %c0_26] : memref<9x8x32xf32, #tpu.memory_space<vmem>>, vector<1x8x32xf32>
    %33 = vector.shape_cast %32 : vector<1x8x32xf32> to vector<8x32xf32>
    %34 = vector.shape_cast %33 : vector<8x32xf32> to vector<1x8x32xf32>
    %35 = vector.broadcast %34 : vector<1x8x32xf32> to vector<8x8x32xf32>
    %36 = arith.mulf %31, %35 : vector<8x8x32xf32>
    %37 = arith.addf %30, %36 : vector<8x8x32xf32>
    %c1_27 = arith.constant 1 : index
    %c0_28 = arith.constant 0 : index
    %c0_29 = arith.constant 0 : index
    %38 = vector.load %arg8[%c1_27, %c0_28, %c0_29] : memref<10x8x32xf32, #tpu.memory_space<vmem>>, vector<8x8x32xf32>
    %c1_i32_30 = arith.constant 1 : i32
    %39 = tpu.dynamic_rotate %38 by %c1_i32_30 dim 1 : vector<8x8x32xf32>, i32 -> vector<8x8x32xf32>
    %c3 = arith.constant 3 : index
    %c0_31 = arith.constant 0 : index
    %c0_32 = arith.constant 0 : index
    %40 = vector.load %arg4[%c3, %c0_31, %c0_32] : memref<9x8x32xf32, #tpu.memory_space<vmem>>, vector<1x8x32xf32>
    %41 = vector.shape_cast %40 : vector<1x8x32xf32> to vector<8x32xf32>
    %42 = vector.shape_cast %41 : vector<8x32xf32> to vector<1x8x32xf32>
    %43 = vector.broadcast %42 : vector<1x8x32xf32> to vector<8x8x32xf32>
    %44 = arith.mulf %39, %43 : vector<8x8x32xf32>
    %45 = arith.addf %37, %44 : vector<8x8x32xf32>
    %c4 = arith.constant 4 : index
    %c0_33 = arith.constant 0 : index
    %c0_34 = arith.constant 0 : index
    %46 = vector.load %arg4[%c4, %c0_33, %c0_34] : memref<9x8x32xf32, #tpu.memory_space<vmem>>, vector<1x8x32xf32>
    %47 = vector.shape_cast %46 : vector<1x8x32xf32> to vector<8x32xf32>
    %48 = vector.shape_cast %47 : vector<8x32xf32> to vector<1x8x32xf32>
    %49 = vector.broadcast %48 : vector<1x8x32xf32> to vector<8x8x32xf32>
    %50 = arith.mulf %38, %49 : vector<8x8x32xf32>
    %51 = arith.addf %45, %50 : vector<8x8x32xf32>
    %c7_i32_35 = arith.constant 7 : i32
    %52 = tpu.dynamic_rotate %38 by %c7_i32_35 dim 1 : vector<8x8x32xf32>, i32 -> vector<8x8x32xf32>
    %c5 = arith.constant 5 : index
    %c0_36 = arith.constant 0 : index
    %c0_37 = arith.constant 0 : index
    %53 = vector.load %arg4[%c5, %c0_36, %c0_37] : memref<9x8x32xf32, #tpu.memory_space<vmem>>, vector<1x8x32xf32>
    %54 = vector.shape_cast %53 : vector<1x8x32xf32> to vector<8x32xf32>
    %55 = vector.shape_cast %54 : vector<8x32xf32> to vector<1x8x32xf32>
    %56 = vector.broadcast %55 : vector<1x8x32xf32> to vector<8x8x32xf32>
    %57 = arith.mulf %52, %56 : vector<8x8x32xf32>
    %58 = arith.addf %51, %57 : vector<8x8x32xf32>
    %c2_38 = arith.constant 2 : index
    %c0_39 = arith.constant 0 : index
    %c0_40 = arith.constant 0 : index
    %59 = vector.load %arg8[%c2_38, %c0_39, %c0_40] : memref<10x8x32xf32, #tpu.memory_space<vmem>>, vector<8x8x32xf32>
    %c1_i32_41 = arith.constant 1 : i32
    %60 = tpu.dynamic_rotate %59 by %c1_i32_41 dim 1 : vector<8x8x32xf32>, i32 -> vector<8x8x32xf32>
    %c6 = arith.constant 6 : index
    %c0_42 = arith.constant 0 : index
    %c0_43 = arith.constant 0 : index
    %61 = vector.load %arg4[%c6, %c0_42, %c0_43] : memref<9x8x32xf32, #tpu.memory_space<vmem>>, vector<1x8x32xf32>
    %62 = vector.shape_cast %61 : vector<1x8x32xf32> to vector<8x32xf32>
    %63 = vector.shape_cast %62 : vector<8x32xf32> to vector<1x8x32xf32>
    %64 = vector.broadcast %63 : vector<1x8x32xf32> to vector<8x8x32xf32>
    %65 = arith.mulf %60, %64 : vector<8x8x32xf32>
    %66 = arith.addf %58, %65 : vector<8x8x32xf32>
    %c7 = arith.constant 7 : index
    %c0_44 = arith.constant 0 : index
    %c0_45 = arith.constant 0 : index
    %67 = vector.load %arg4[%c7, %c0_44, %c0_45] : memref<9x8x32xf32, #tpu.memory_space<vmem>>, vector<1x8x32xf32>
    %68 = vector.shape_cast %67 : vector<1x8x32xf32> to vector<8x32xf32>
    %69 = vector.shape_cast %68 : vector<8x32xf32> to vector<1x8x32xf32>
    %70 = vector.broadcast %69 : vector<1x8x32xf32> to vector<8x8x32xf32>
    %71 = arith.mulf %59, %70 : vector<8x8x32xf32>
    %72 = arith.addf %66, %71 : vector<8x8x32xf32>
    %c7_i32_46 = arith.constant 7 : i32
    %73 = tpu.dynamic_rotate %59 by %c7_i32_46 dim 1 : vector<8x8x32xf32>, i32 -> vector<8x8x32xf32>
    %c8 = arith.constant 8 : index
    %c0_47 = arith.constant 0 : index
    %c0_48 = arith.constant 0 : index
    %74 = vector.load %arg4[%c8, %c0_47, %c0_48] : memref<9x8x32xf32, #tpu.memory_space<vmem>>, vector<1x8x32xf32>
    %75 = vector.shape_cast %74 : vector<1x8x32xf32> to vector<8x32xf32>
    %76 = vector.shape_cast %75 : vector<8x32xf32> to vector<1x8x32xf32>
    %77 = vector.broadcast %76 : vector<1x8x32xf32> to vector<8x8x32xf32>
    %78 = arith.mulf %73, %77 : vector<8x8x32xf32>
    %79 = arith.addf %72, %78 : vector<8x8x32xf32>
    %c0_49 = arith.constant 0 : index
    %c0_50 = arith.constant 0 : index
    %80 = vector.load %arg5[%c0_49, %c0_50] : memref<1x32xf32, #tpu.memory_space<vmem>>, vector<1x32xf32>
    %81 = vector.shape_cast %80 : vector<1x32xf32> to vector<1x1x32xf32>
    %82 = vector.broadcast %81 : vector<1x1x32xf32> to vector<8x8x32xf32>
    %83 = arith.addf %79, %82 : vector<8x8x32xf32>
    %cst_51 = arith.constant 5.000000e-01 : f32
    %84 = vector.broadcast %cst_51 : f32 to vector<8x8x32xf32>
    %85 = arith.mulf %84, %83 : vector<8x8x32xf32>
    %cst_52 = arith.constant 0.707106769 : f32
    %86 = vector.broadcast %cst_52 : f32 to vector<8x8x32xf32>
    %87 = arith.mulf %83, %86 : vector<8x8x32xf32>
    %88 = math.erf %87 : vector<8x8x32xf32>
    %cst_53 = arith.constant 1.000000e+00 : f32
    %89 = vector.broadcast %cst_53 : f32 to vector<8x8x32xf32>
    %90 = arith.addf %89, %88 : vector<8x8x32xf32>
    %91 = arith.mulf %85, %90 : vector<8x8x32xf32>
    %92 = arith.truncf %91 : vector<8x8x32xf32> to vector<8x8x32xbf16>
    %c0_54 = arith.constant 0 : index
    %c0_55 = arith.constant 0 : index
    %c0_56 = arith.constant 0 : index
    %c0_57 = arith.constant 0 : index
    %93 = vector.load %arg6[%c0_54, %c0_55, %c0_56, %c0_57] : memref<1x8x8x32xbf16, #tpu.memory_space<vmem>>, vector<1x8x8x32xbf16>
    %94 = vector.shape_cast %93 : vector<1x8x8x32xbf16> to vector<8x8x32xbf16>
    %95 = vector.shape_cast %92 : vector<8x8x32xbf16> to vector<1x8x8x32xbf16>
    tpu.vector_store %arg6[%c0_54, %c0_55, %c0_56, %c0_57], %95 {strides = array<i32>} : memref<1x8x8x32xbf16, #tpu.memory_space<vmem>>, vector<1x8x8x32xbf16>,
    %cst_58 = arith.constant dense<0.000000e+00> : vector<32xf32>
    %96 = vector.multi_reduction <add>, %91, %cst_58 [0, 1] : vector<8x8x32xf32> to vector<32xf32>
    %97 = vector.shape_cast %96 : vector<32xf32> to vector<1x1x32xf32>
    %cst_59 = arith.constant 6.400000e+01 : f32
    %98 = vector.broadcast %cst_59 : f32 to vector<1x1x32xf32>
    %99 = arith.divf %97, %98 : vector<1x1x32xf32>
    %100 = vector.broadcast %99 : vector<1x1x32xf32> to vector<8x8x32xf32>
    %101 = arith.subf %91, %100 : vector<8x8x32xf32>
    %102 = arith.mulf %101, %101 : vector<8x8x32xf32>
    %cst_60 = arith.constant dense<0.000000e+00> : vector<32xf32>
    %103 = vector.multi_reduction <add>, %102, %cst_60 [0, 1] : vector<8x8x32xf32> to vector<32xf32>
    %104 = vector.shape_cast %103 : vector<32xf32> to vector<1x1x32xf32>
    %105 = vector.shape_cast %99 : vector<1x1x32xf32> to vector<1x32xf32>
    %106 = vector.shape_cast %104 : vector<1x1x32xf32> to vector<1x32xf32>
    %107 = tpu.concatenate %105, %106 in 0 : vector<1x32xf32>, vector<1x32xf32> -> vector<2x32xf32>
    %c0_61 = arith.constant 0 : index
    %c0_62 = arith.constant 0 : index
    %c0_63 = arith.constant 0 : index
    %108 = vector.load %arg7[%c0_61, %c0_62, %c0_63] : memref<1x2x32xf32, #tpu.memory_space<vmem>>, vector<1x2x32xf32>
    %109 = vector.shape_cast %108 : vector<1x2x32xf32> to vector<2x32xf32>
    %110 = vector.shape_cast %107 : vector<2x32xf32> to vector<1x2x32xf32>
    tpu.vector_store %arg7[%c0_61, %c0_62, %c0_63], %110 {strides = array<i32>} : memref<1x2x32xf32, #tpu.memory_space<vmem>>, vector<1x2x32xf32>,
    return
  }
  func.func @transform_0(%arg0: i32) -> (i32, i32, i32, i32) {
    %c0_i32 = arith.constant 0 : i32
    %c0_i32_0 = arith.constant 0 : i32
    %c0_i32_1 = arith.constant 0 : i32
    %c0_i32_2 = arith.constant 0 : i32
    return %arg0, %c0_i32, %c0_i32_0, %c0_i32_1 : i32, i32, i32, i32
  }
  func.func @transform_1(%arg0: i32) -> (i32, i32) {
    %c0_i32 = arith.constant 0 : i32
    %c0_i32_0 = arith.constant 0 : i32
    %c0_i32_1 = arith.constant 0 : i32
    return %c0_i32, %c0_i32_0 : i32, i32
  }
  func.func @transform_2(%arg0: i32) -> (i32, i32) {
    %c0_i32 = arith.constant 0 : i32
    %c0_i32_0 = arith.constant 0 : i32
    %c0_i32_1 = arith.constant 0 : i32
    return %c0_i32, %c0_i32_0 : i32, i32
  }
  func.func @transform_3(%arg0: i32) -> (i32, i32, i32) {
    %c0_i32 = arith.constant 0 : i32
    %c0_i32_0 = arith.constant 0 : i32
    %c0_i32_1 = arith.constant 0 : i32
    %c0_i32_2 = arith.constant 0 : i32
    return %c0_i32, %c0_i32_0, %c0_i32_1 : i32, i32, i32
  }
  func.func @transform_4(%arg0: i32) -> (i32, i32) {
    %c0_i32 = arith.constant 0 : i32
    %c0_i32_0 = arith.constant 0 : i32
    %c0_i32_1 = arith.constant 0 : i32
    return %c0_i32, %c0_i32_0 : i32, i32
  }
  func.func @transform_5(%arg0: i32) -> (i32, i32, i32, i32) {
    %c0_i32 = arith.constant 0 : i32
    %c0_i32_0 = arith.constant 0 : i32
    %c0_i32_1 = arith.constant 0 : i32
    %c0_i32_2 = arith.constant 0 : i32
    return %arg0, %c0_i32, %c0_i32_0, %c0_i32_1 : i32, i32, i32, i32
  }
  func.func @transform_6(%arg0: i32) -> (i32, i32, i32) {
    %c0_i32 = arith.constant 0 : i32
    %c0_i32_0 = arith.constant 0 : i32
    %c0_i32_1 = arith.constant 0 : i32
    return %arg0, %c0_i32, %c0_i32_0 : i32, i32, i32
  }
}

module attributes {stable_mosaic.version = 11 : i64} {
  func.func @head_kernel(%arg0: i32, %arg1: memref<2x64x32xbf16, #tpu.memory_space<vmem>>, %arg2: memref<1x32xf32, #tpu.memory_space<vmem>>, %arg3: memref<1x32xf32, #tpu.memory_space<vmem>>, %arg4: memref<32x10xbf16, #tpu.memory_space<vmem>>, %arg5: memref<1x10xf32, #tpu.memory_space<vmem>>, %arg6: memref<2x10xf32, #tpu.memory_space<vmem>>) attributes {dimension_semantics = [#tpu.dimension_semantics<parallel>], iteration_bounds = array<i64: 1>, scalar_prefetch = 0 : i64, scratch_operands = 0 : i64, tpu.core_type = #tpu.core_type<tc>, window_params = [{transform_indices = @transform_0, window_bounds = array<i64: 2, 64, 32>}, {pipeline_mode = #tpu.pipeline_mode<synchronous>, transform_indices = @transform_1, window_bounds = array<i64: 1, 32>}, {pipeline_mode = #tpu.pipeline_mode<synchronous>, transform_indices = @transform_2, window_bounds = array<i64: 1, 32>}, {pipeline_mode = #tpu.pipeline_mode<synchronous>, transform_indices = @transform_3, window_bounds = array<i64: 32, 10>}, {pipeline_mode = #tpu.pipeline_mode<synchronous>, transform_indices = @transform_4, window_bounds = array<i64: 1, 10>}, {transform_indices = @transform_5, window_bounds = array<i64: 2, 10>}]} {
    %c0 = arith.constant 0 : index
    %c0_0 = arith.constant 0 : index
    %c0_1 = arith.constant 0 : index
    %0 = vector.load %arg1[%c0, %c0_0, %c0_1] : memref<2x64x32xbf16, #tpu.memory_space<vmem>>, vector<2x64x32xbf16>
    %1 = arith.extf %0 : vector<2x64x32xbf16> to vector<2x64x32xf32>
    %cst = arith.constant dense<0.000000e+00> : vector<2x32xf32>
    %2 = vector.multi_reduction <add>, %1, %cst [1] : vector<2x64x32xf32> to vector<2x32xf32>
    %cst_2 = arith.constant 6.400000e+01 : f32
    %3 = vector.broadcast %cst_2 : f32 to vector<2x32xf32>
    %4 = arith.divf %2, %3 : vector<2x32xf32>
    %c0_3 = arith.constant 0 : index
    %c0_4 = arith.constant 0 : index
    %5 = vector.load %arg2[%c0_3, %c0_4] : memref<1x32xf32, #tpu.memory_space<vmem>>, vector<1x32xf32>
    %6 = vector.broadcast %5 : vector<1x32xf32> to vector<2x32xf32>
    %7 = arith.mulf %4, %6 : vector<2x32xf32>
    %c0_5 = arith.constant 0 : index
    %c0_6 = arith.constant 0 : index
    %8 = vector.load %arg3[%c0_5, %c0_6] : memref<1x32xf32, #tpu.memory_space<vmem>>, vector<1x32xf32>
    %9 = vector.broadcast %8 : vector<1x32xf32> to vector<2x32xf32>
    %10 = arith.addf %7, %9 : vector<2x32xf32>
    %11 = arith.truncf %10 : vector<2x32xf32> to vector<2x32xbf16>
    %c0_7 = arith.constant 0 : index
    %c0_8 = arith.constant 0 : index
    %12 = vector.load %arg4[%c0_7, %c0_8] : memref<32x10xbf16, #tpu.memory_space<vmem>>, vector<32x10xbf16>
    %cst_9 = arith.constant dense<0.000000e+00> : vector<2x10xf32>
    %13 = tpu.matmul %11, %12, %cst_9 {dimension_numbers = #tpu.dot_dimension_numbers<[1], [0], [0], [1], [0, 0, 1, 1], [], []>} : vector<2x32xbf16>, vector<32x10xbf16>, vector<2x10xf32> -> vector<2x10xf32>
    %c0_10 = arith.constant 0 : index
    %c0_11 = arith.constant 0 : index
    %14 = vector.load %arg5[%c0_10, %c0_11] : memref<1x10xf32, #tpu.memory_space<vmem>>, vector<1x10xf32>
    %15 = vector.broadcast %14 : vector<1x10xf32> to vector<2x10xf32>
    %16 = arith.addf %13, %15 : vector<2x10xf32>
    %c0_12 = arith.constant 0 : index
    %c0_13 = arith.constant 0 : index
    %17 = vector.load %arg6[%c0_12, %c0_13] : memref<2x10xf32, #tpu.memory_space<vmem>>, vector<2x10xf32>
    tpu.vector_store %arg6[%c0_12, %c0_13], %16 {strides = array<i32>} : memref<2x10xf32, #tpu.memory_space<vmem>>, vector<2x10xf32>,
    return
  }
  func.func @transform_0(%arg0: i32) -> (i32, i32, i32) {
    %c0_i32 = arith.constant 0 : i32
    %c0_i32_0 = arith.constant 0 : i32
    %c0_i32_1 = arith.constant 0 : i32
    return %arg0, %c0_i32, %c0_i32_0 : i32, i32, i32
  }
  func.func @transform_1(%arg0: i32) -> (i32, i32) {
    %c0_i32 = arith.constant 0 : i32
    %c0_i32_0 = arith.constant 0 : i32
    %c0_i32_1 = arith.constant 0 : i32
    return %c0_i32, %c0_i32_0 : i32, i32
  }
  func.func @transform_2(%arg0: i32) -> (i32, i32) {
    %c0_i32 = arith.constant 0 : i32
    %c0_i32_0 = arith.constant 0 : i32
    %c0_i32_1 = arith.constant 0 : i32
    return %c0_i32, %c0_i32_0 : i32, i32
  }
  func.func @transform_3(%arg0: i32) -> (i32, i32) {
    %c0_i32 = arith.constant 0 : i32
    %c0_i32_0 = arith.constant 0 : i32
    %c0_i32_1 = arith.constant 0 : i32
    return %c0_i32, %c0_i32_0 : i32, i32
  }
  func.func @transform_4(%arg0: i32) -> (i32, i32) {
    %c0_i32 = arith.constant 0 : i32
    %c0_i32_0 = arith.constant 0 : i32
    %c0_i32_1 = arith.constant 0 : i32
    return %c0_i32, %c0_i32_0 : i32, i32
  }
  func.func @transform_5(%arg0: i32) -> (i32, i32) {
    %c0_i32 = arith.constant 0 : i32
    %c0_i32_0 = arith.constant 0 : i32
    return %arg0, %c0_i32 : i32, i32
  }
}

module attributes {stable_mosaic.version = 11 : i64} {
  func.func @pw_kernel(%arg0: i32, %arg1: memref<128x32xbf16, #tpu.memory_space<vmem>>, %arg2: memref<1x32xf32, #tpu.memory_space<vmem>>, %arg3: memref<1x32xf32, #tpu.memory_space<vmem>>, %arg4: memref<128x32xbf16, #tpu.memory_space<vmem>>, %arg5: memref<1x32xf32, #tpu.memory_space<vmem>>, %arg6: memref<1x32xf32, #tpu.memory_space<vmem>>, %arg7: memref<32x32xbf16, #tpu.memory_space<vmem>>, %arg8: memref<1x32xf32, #tpu.memory_space<vmem>>, %arg9: memref<128x32xbf16, #tpu.memory_space<vmem>>, %arg10: memref<1x2x32xf32, #tpu.memory_space<vmem>>) attributes {dimension_semantics = [#tpu.dimension_semantics<parallel>], iteration_bounds = array<i64: 1>, scalar_prefetch = 0 : i64, scratch_operands = 0 : i64, tpu.core_type = #tpu.core_type<tc>, window_params = [{transform_indices = @transform_0, window_bounds = array<i64: 128, 32>}, {pipeline_mode = #tpu.pipeline_mode<synchronous>, transform_indices = @transform_1, window_bounds = array<i64: 1, 32>}, {pipeline_mode = #tpu.pipeline_mode<synchronous>, transform_indices = @transform_2, window_bounds = array<i64: 1, 32>}, {transform_indices = @transform_3, window_bounds = array<i64: 128, 32>}, {pipeline_mode = #tpu.pipeline_mode<synchronous>, transform_indices = @transform_4, window_bounds = array<i64: 1, 32>}, {pipeline_mode = #tpu.pipeline_mode<synchronous>, transform_indices = @transform_5, window_bounds = array<i64: 1, 32>}, {pipeline_mode = #tpu.pipeline_mode<synchronous>, transform_indices = @transform_6, window_bounds = array<i64: 32, 32>}, {pipeline_mode = #tpu.pipeline_mode<synchronous>, transform_indices = @transform_7, window_bounds = array<i64: 1, 32>}, {transform_indices = @transform_8, window_bounds = array<i64: 128, 32>}, {transform_indices = @transform_9, window_bounds = array<i64: 1, 2, 32>}]} {
    %c0 = arith.constant 0 : index
    %c0_0 = arith.constant 0 : index
    %0 = vector.load %arg1[%c0, %c0_0] : memref<128x32xbf16, #tpu.memory_space<vmem>>, vector<128x32xbf16>
    %1 = arith.extf %0 : vector<128x32xbf16> to vector<128x32xf32>
    %c0_1 = arith.constant 0 : index
    %c0_2 = arith.constant 0 : index
    %2 = vector.load %arg2[%c0_1, %c0_2] : memref<1x32xf32, #tpu.memory_space<vmem>>, vector<1x32xf32>
    %3 = vector.broadcast %2 : vector<1x32xf32> to vector<128x32xf32>
    %4 = arith.mulf %1, %3 : vector<128x32xf32>
    %c0_3 = arith.constant 0 : index
    %c0_4 = arith.constant 0 : index
    %5 = vector.load %arg3[%c0_3, %c0_4] : memref<1x32xf32, #tpu.memory_space<vmem>>, vector<1x32xf32>
    %6 = vector.broadcast %5 : vector<1x32xf32> to vector<128x32xf32>
    %7 = arith.addf %4, %6 : vector<128x32xf32>
    %c0_5 = arith.constant 0 : index
    %c0_6 = arith.constant 0 : index
    %8 = vector.load %arg4[%c0_5, %c0_6] : memref<128x32xbf16, #tpu.memory_space<vmem>>, vector<128x32xbf16>
    %9 = arith.extf %8 : vector<128x32xbf16> to vector<128x32xf32>
    %c0_7 = arith.constant 0 : index
    %c0_8 = arith.constant 0 : index
    %10 = vector.load %arg5[%c0_7, %c0_8] : memref<1x32xf32, #tpu.memory_space<vmem>>, vector<1x32xf32>
    %11 = vector.broadcast %10 : vector<1x32xf32> to vector<128x32xf32>
    %12 = arith.mulf %9, %11 : vector<128x32xf32>
    %c0_9 = arith.constant 0 : index
    %c0_10 = arith.constant 0 : index
    %13 = vector.load %arg6[%c0_9, %c0_10] : memref<1x32xf32, #tpu.memory_space<vmem>>, vector<1x32xf32>
    %14 = vector.broadcast %13 : vector<1x32xf32> to vector<128x32xf32>
    %15 = arith.addf %12, %14 : vector<128x32xf32>
    %16 = arith.addf %15, %7 : vector<128x32xf32>
    %17 = arith.truncf %16 : vector<128x32xf32> to vector<128x32xbf16>
    %c0_11 = arith.constant 0 : index
    %c0_12 = arith.constant 0 : index
    %18 = vector.load %arg7[%c0_11, %c0_12] : memref<32x32xbf16, #tpu.memory_space<vmem>>, vector<32x32xbf16>
    %cst = arith.constant dense<0.000000e+00> : vector<128x32xf32>
    %19 = tpu.matmul %17, %18, %cst {dimension_numbers = #tpu.dot_dimension_numbers<[1], [0], [0], [1], [0, 0, 1, 1], [], []>} : vector<128x32xbf16>, vector<32x32xbf16>, vector<128x32xf32> -> vector<128x32xf32>
    %c0_13 = arith.constant 0 : index
    %c0_14 = arith.constant 0 : index
    %20 = vector.load %arg8[%c0_13, %c0_14] : memref<1x32xf32, #tpu.memory_space<vmem>>, vector<1x32xf32>
    %21 = vector.broadcast %20 : vector<1x32xf32> to vector<128x32xf32>
    %22 = arith.addf %19, %21 : vector<128x32xf32>
    %cst_15 = arith.constant 5.000000e-01 : f32
    %23 = vector.broadcast %cst_15 : f32 to vector<128x32xf32>
    %24 = arith.mulf %23, %22 : vector<128x32xf32>
    %cst_16 = arith.constant 0.707106769 : f32
    %25 = vector.broadcast %cst_16 : f32 to vector<128x32xf32>
    %26 = arith.mulf %22, %25 : vector<128x32xf32>
    %27 = math.erf %26 : vector<128x32xf32>
    %cst_17 = arith.constant 1.000000e+00 : f32
    %28 = vector.broadcast %cst_17 : f32 to vector<128x32xf32>
    %29 = arith.addf %28, %27 : vector<128x32xf32>
    %30 = arith.mulf %24, %29 : vector<128x32xf32>
    %31 = arith.truncf %30 : vector<128x32xf32> to vector<128x32xbf16>
    %c0_18 = arith.constant 0 : index
    %c0_19 = arith.constant 0 : index
    %32 = vector.load %arg9[%c0_18, %c0_19] : memref<128x32xbf16, #tpu.memory_space<vmem>>, vector<128x32xbf16>
    tpu.vector_store %arg9[%c0_18, %c0_19], %31 {strides = array<i32>} : memref<128x32xbf16, #tpu.memory_space<vmem>>, vector<128x32xbf16>,
    %cst_20 = arith.constant dense<0.000000e+00> : vector<32xf32>
    %33 = vector.multi_reduction <add>, %30, %cst_20 [0] : vector<128x32xf32> to vector<32xf32>
    %34 = vector.shape_cast %33 : vector<32xf32> to vector<1x32xf32>
    %cst_21 = arith.constant 1.280000e+02 : f32
    %35 = vector.broadcast %cst_21 : f32 to vector<1x32xf32>
    %36 = arith.divf %34, %35 : vector<1x32xf32>
    %37 = vector.broadcast %36 : vector<1x32xf32> to vector<128x32xf32>
    %38 = arith.subf %30, %37 : vector<128x32xf32>
    %39 = arith.mulf %38, %38 : vector<128x32xf32>
    %cst_22 = arith.constant dense<0.000000e+00> : vector<32xf32>
    %40 = vector.multi_reduction <add>, %39, %cst_22 [0] : vector<128x32xf32> to vector<32xf32>
    %41 = vector.shape_cast %40 : vector<32xf32> to vector<1x32xf32>
    %42 = tpu.concatenate %36, %41 in 0 : vector<1x32xf32>, vector<1x32xf32> -> vector<2x32xf32>
    %c0_23 = arith.constant 0 : index
    %c0_24 = arith.constant 0 : index
    %c0_25 = arith.constant 0 : index
    %43 = vector.load %arg10[%c0_23, %c0_24, %c0_25] : memref<1x2x32xf32, #tpu.memory_space<vmem>>, vector<1x2x32xf32>
    %44 = vector.shape_cast %43 : vector<1x2x32xf32> to vector<2x32xf32>
    %45 = vector.shape_cast %42 : vector<2x32xf32> to vector<1x2x32xf32>
    tpu.vector_store %arg10[%c0_23, %c0_24, %c0_25], %45 {strides = array<i32>} : memref<1x2x32xf32, #tpu.memory_space<vmem>>, vector<1x2x32xf32>,
    return
  }
  func.func @transform_0(%arg0: i32) -> (i32, i32) {
    %c0_i32 = arith.constant 0 : i32
    %c0_i32_0 = arith.constant 0 : i32
    return %arg0, %c0_i32 : i32, i32
  }
  func.func @transform_1(%arg0: i32) -> (i32, i32) {
    %c0_i32 = arith.constant 0 : i32
    %c0_i32_0 = arith.constant 0 : i32
    %c0_i32_1 = arith.constant 0 : i32
    return %c0_i32, %c0_i32_0 : i32, i32
  }
  func.func @transform_2(%arg0: i32) -> (i32, i32) {
    %c0_i32 = arith.constant 0 : i32
    %c0_i32_0 = arith.constant 0 : i32
    %c0_i32_1 = arith.constant 0 : i32
    return %c0_i32, %c0_i32_0 : i32, i32
  }
  func.func @transform_3(%arg0: i32) -> (i32, i32) {
    %c0_i32 = arith.constant 0 : i32
    %c0_i32_0 = arith.constant 0 : i32
    return %arg0, %c0_i32 : i32, i32
  }
  func.func @transform_4(%arg0: i32) -> (i32, i32) {
    %c0_i32 = arith.constant 0 : i32
    %c0_i32_0 = arith.constant 0 : i32
    %c0_i32_1 = arith.constant 0 : i32
    return %c0_i32, %c0_i32_0 : i32, i32
  }
  func.func @transform_5(%arg0: i32) -> (i32, i32) {
    %c0_i32 = arith.constant 0 : i32
    %c0_i32_0 = arith.constant 0 : i32
    %c0_i32_1 = arith.constant 0 : i32
    return %c0_i32, %c0_i32_0 : i32, i32
  }
  func.func @transform_6(%arg0: i32) -> (i32, i32) {
    %c0_i32 = arith.constant 0 : i32
    %c0_i32_0 = arith.constant 0 : i32
    %c0_i32_1 = arith.constant 0 : i32
    return %c0_i32, %c0_i32_0 : i32, i32
  }
  func.func @transform_7(%arg0: i32) -> (i32, i32) {
    %c0_i32 = arith.constant 0 : i32
    %c0_i32_0 = arith.constant 0 : i32
    %c0_i32_1 = arith.constant 0 : i32
    return %c0_i32, %c0_i32_0 : i32, i32
  }
  func.func @transform_8(%arg0: i32) -> (i32, i32) {
    %c0_i32 = arith.constant 0 : i32
    %c0_i32_0 = arith.constant 0 : i32
    return %arg0, %c0_i32 : i32, i32
  }
  func.func @transform_9(%arg0: i32) -> (i32, i32, i32) {
    %c0_i32 = arith.constant 0 : i32
    %c0_i32_0 = arith.constant 0 : i32
    %c0_i32_1 = arith.constant 0 : i32
    return %arg0, %c0_i32, %c0_i32_0 : i32, i32, i32
  }
}

</mosaic_0001>

<bundles_post_ra>
// kernel: convmixer_forward.6
= control target key start
LH: loop header
LB: loop body
LE: loop exit
PB: predicated region body
PF: predicated region fallthrough
CT: control target
= control target key end

     0   :  { %vm489_vm0 = vcmask 257024   ;;  %vm506_vm1 = vcmask 261120   ;;  %vm615_vm2 = vcmask 1040384   ;;  %vm617_vm3 = vcmask 254976   ;;  %s1244_s1 = inlined_call_operand.vmem [shape: bf16[256,32], index: 1, kind: input, shape index: {}]   ;;  %s1245_s0 = inlined_call_operand.vmem [shape: bf16[128,256], index: 0, kind: input, shape index: {}]   ;;  %s1246_s2 = inlined_call_operand.vmem [shape: f32[1,32], index: 2, kind: input, shape index: {}]   ;;  %s1247_s3 = inlined_call_operand.vmem [shape: bf16[128,32], index: 3, kind: output, shape index: {0}]   ;;  %s1248_s4 = inlined_call_operand.vmem [shape: f32[1,2,32], index: 4, kind: output, shape index: {1}]  }
   0x1   :  { %v772_v0 = vld [vmem:[%s1244_s1 + $0x78] sm:$0xff]   ;;  %v774_v2 = vld [vmem:[%s1244_s1 + $0x70] sm:$0xff]   ;;  %v776_v4 = vld [vmem:[%s1244_s1 + $0x68] sm:$0xff]  }
   0x2   :  { %v773_v1 = vld [vmem:[%s1244_s1 + $0x38] sm:$0xff]   ;;  %692 = vmatprep.subr.bf16.mxu0 %v772_v0  ;;  %756 = vmatprep.subr.bf16.mxu1 %v772_v0  ;;  %v775_v3 = vld [vmem:[%s1244_s1 + $0x30] sm:$0xff]   ;;  %v777_v5 = vld [vmem:[%s1244_s1 + $0x28] sm:$0xff]  }
   0x3   :  { %693 = vmatpush3.bf16.msra.mxu0 %v773_v1  ;;  %764 = vmatpush3.bf16.msra.mxu1 %v773_v1  ;;  %v778_v6 = vld [vmem:[%s1244_s1 + $0x60] sm:$0xff]   ;;  %v780_v8 = vld [vmem:[%s1244_s1 + $0x58] sm:$0xff]   ;;  %v782_v10 = vld [vmem:[%s1244_s1 + $0x50] sm:$0xff]  }
   0x4   :  { %694 = vmatprep.subr.bf16.mxu0 %v774_v2  ;;  %757 = vmatprep.subr.bf16.mxu1 %v774_v2  ;;  %v779_v7 = vld [vmem:[%s1244_s1 + $0x20] sm:$0xff]   ;;  %v781_v9 = vld [vmem:[%s1244_s1 + $0x18] sm:$0xff]   ;;  %v783_v13 = vld [vmem:[%s1244_s1 + $0x10] sm:$0xff]  }
   0x5   :  { %v790_v11 = vld [vmem:[%s1245_s0 + $0x4] ss:$8 sps:$4 sm:$0xff]   ;;  %v788_v18 = vld [vmem:[%s1245_s0] ss:$8 sps:$4 sm:$0xff]   ;;  %v794_v20 = vld [vmem:[%s1245_s0 + $0x14] ss:$8 sps:$4 sm:$0xff]  }
   0x6   :  { %v793_v12 = vld [vmem:[%s1245_s0 + $0x44] ss:$8 sps:$4 sm:$0xff]   ;;  %280 = vmatprep.mubr.bf16.mxu0 %v790_v11  ;;  %v791_v19 = vld [vmem:[%s1245_s0 + $0x40] ss:$8 sps:$4 sm:$0xff]   ;;  %v796_v21 = vld [vmem:[%s1245_s0 + $0x54] ss:$8 sps:$4 sm:$0xff]  }
   0x7   :  { %695 = vmatpush3.bf16.msra.mxu0 %v775_v3  ;;  %765 = vmatpush3.bf16.msra.mxu1 %v775_v3  ;;  %v784_v14 = vld [vmem:[%s1244_s1 + $0x48] sm:$0xff]   ;;  %v786_v16 = vld [vmem:[%s1244_s1 + $0x40] sm:$0xff]   ;;  %v798_v22 = vld [vmem:[%s1245_s0 + $0x10] ss:$8 sps:$4 sm:$0xff]  }
   0x8   :  { %696 = vmatprep.subr.bf16.mxu0 %v776_v4  ;;  %758 = vmatprep.subr.bf16.mxu1 %v776_v4  ;;  %v785_v15 = vld [vmem:[%s1244_s1 + $0x8] sm:$0xff]   ;;  %v787_v17 = vld [vmem:[%s1244_s1] sm:$0xff]   ;;  %v799_v23 = vld [vmem:[%s1245_s0 + $0x50] ss:$8 sps:$4 sm:$0xff]  }
   0x9   :  { %312 = vmatprep.mubr.bf16.mxu1 %v793_v12  ;;  %v800_v24 = vld [vmem:[%s1245_s0 + $0x24] ss:$8 sps:$4 sm:$0xff]   ;;  %v804_v26 = vld [vmem:[%s1245_s0 + $0x20] ss:$8 sps:$4 sm:$0xff]   ;;  %v806_v28 = vld [vmem:[%s1245_s0 + $0x34] ss:$8 sps:$4 sm:$0xff]  }
   0xa   :  { %v802_v25 = vld [vmem:[%s1245_s0 + $0x64] ss:$8 sps:$4 sm:$0xff]   ;;  %v805_v27 = vld [vmem:[%s1245_s0 + $0x60] ss:$8 sps:$4 sm:$0xff]   ;;  %v808_v29 = vld [vmem:[%s1245_s0 + $0x74] ss:$8 sps:$4 sm:$0xff]  }
   0xb   :  { %697 = vmatpush3.bf16.msra.mxu0 %v777_v5  ;;  %766 = vmatpush3.bf16.msra.mxu1 %v777_v5  ;;  %v810_v30 = vld [vmem:[%s1245_s0 + $0x30] ss:$8 sps:$4 sm:$0xff]   ;;  %v968_v34 = vld [vmem:[%s1246_s2] ss:$0 sm:$0xff] }
   0xc   :  { %698 = vmatprep.subr.bf16.mxu0 %v778_v6  ;;  %759 = vmatprep.subr.bf16.mxu1 %v778_v6  ;;  %v811_v31 = vld [vmem:[%s1245_s0 + $0x70] ss:$8 sps:$4 sm:$0xff]  }
   0xf   :  { %699 = vmatpush3.bf16.msra.mxu0 %v779_v7  ;;  %767 = vmatpush3.bf16.msra.mxu1 %v779_v7 }
  0x10   :  { %700 = vmatprep.subr.bf16.mxu0 %v780_v8  ;;  %760 = vmatprep.subr.bf16.mxu1 %v780_v8 }
  0x13   :  { %701 = vmatpush3.bf16.msra.mxu0 %v781_v9  ;;  %768 = vmatpush3.bf16.msra.mxu1 %v781_v9 }
  0x14   :  { %702 = vmatprep.subr.bf16.mxu0 %v782_v10  ;;  %761 = vmatprep.subr.bf16.mxu1 %v782_v10 }
  0x17   :  { %703 = vmatpush3.bf16.msra.mxu0 %v783_v13  ;;  %769 = vmatpush3.bf16.msra.mxu1 %v783_v13 }
  0x18   :  { %704 = vmatprep.subr.bf16.mxu0 %v784_v14  ;;  %762 = vmatprep.subr.bf16.mxu1 %v784_v14 }
  0x1b   :  { %705 = vmatpush3.bf16.msra.mxu0 %v785_v15  ;;  %770 = vmatpush3.bf16.msra.mxu1 %v785_v15 }
  0x1c   :  { %706 = vmatprep.subr.bf16.mxu0 %v786_v16  ;;  %763 = vmatprep.subr.bf16.mxu1 %v786_v16 }
  0x1f   :  { %707 = vmatpush3.bf16.msra.mxu0 %v787_v17  ;;  %771 = vmatpush3.bf16.msra.mxu1 %v787_v17 }
  0x22   :  { %281 = vmatmul.mubr.bf16.vlgmr.msra.gmra.mxu0 %v788_v18  ;;  %313 = vmatmul.mubr.bf16.vlgmr.msra.gmra.mxu1 %v791_v19 }
  0x23   :  { %288 = vmatprep.mubr.bf16.mxu0 %v794_v20  ;;  %320 = vmatprep.mubr.bf16.mxu1 %v796_v21 }
  0x2a   :  { %289 = vmatmul.mubr.bf16.gmra.mxu0 %v798_v22  ;;  %321 = vmatmul.mubr.bf16.gmra.mxu1 %v799_v23 }
  0x2b   :  { %296 = vmatprep.mubr.bf16.mxu0 %v800_v24  ;;  %328 = vmatprep.mubr.bf16.mxu1 %v802_v25 }
  0x32   :  { %297 = vmatmul.mubr.bf16.gmra.mxu0 %v804_v26  ;;  %329 = vmatmul.mubr.bf16.gmra.mxu1 %v805_v27 }
  0x33   :  { %304 = vmatprep.mubr.bf16.mxu0 %v806_v28  ;;  %336 = vmatprep.mubr.bf16.mxu1 %v808_v29 }
  0x3a   :  { %305 = vmatmul.mubr.bf16.gmra.mxu0 %v810_v30  ;;  %337 = vmatmul.mubr.bf16.gmra.mxu1 %v811_v31 }
  0xe2   :  { %v708_v32 = vpop.f32.mrf.mxu0  ;;  %v732_v33 = vpop.f32.mrf.mxu1 }
  0xe4   :  { %v709_v35 = vpop.f32.mrf.mxu0  ;;  %v733_v36 = vpop.f32.mrf.mxu1 }
  0xe5   :  { %v710_v37 = vadd.f32 %v709_v35, %v708_v32  ;;  %v734_v38 = vadd.f32 %v733_v36, %v732_v33 }
  0xe6   :  { %v711_v39 = vpop.f32.mrf.mxu0  ;;  %v735_v40 = vpop.f32.mrf.mxu1 }
  0xe7   :  { %v283_v41 = vadd.f32 %v710_v37, %v968_v34  ;;  %v315_v42 = vadd.f32 %v734_v38, %v968_v34 }
  0xe8   :  { %v712_v43 = vpop.f32.mrf.mxu0  ;;  %v736_v44 = vpop.f32.mrf.mxu1 }
  0xe9   :  { %v361_v45 = vmul.f32 0.70710677, %v283_v41  ;;  %v369_v46 = vmul.f32 0.70710677, %v315_v42  ;;  %v713_v47 = vadd.f32 %v712_v43, %v711_v39  ;;  %v737_v48 = vadd.f32 %v736_v44, %v735_v40 }
  0xea   :  { %v714_v49 = vpop.f32.mrf.mxu0  ;;  %v738_v50 = vpop.f32.mrf.mxu1  ;;  %v345_v23 = vmul.f32 0.5, %v283_v41  ;;  %v353_v26 = vmul.f32 0.5, %v315_v42 }
  0xeb   :  { %812 = verf.f32 %v361_v45  ;;  %v973_v51 = vadd.f32 %v713_v47, %v968_v34  ;;  %v976_v52 = vadd.f32 %v737_v48, %v968_v34 }
  0xec   :  { %814 = verf.f32 %v369_v46  ;;  %v715_v53 = vpop.f32.mrf.mxu0  ;;  %v739_v54 = vpop.f32.mrf.mxu1 }
  0xed   :  { %v716_v55 = vadd.f32 %v715_v53, %v714_v49  ;;  %v740_v56 = vadd.f32 %v739_v54, %v738_v50  ;;  %v362_v57 = vmul.f32 0.70710677, %v973_v51  ;;  %v370_v58 = vmul.f32 0.70710677, %v976_v52 }
  0xee   :  { %v717_v59 = vpop.f32.mrf.mxu0  ;;  %v741_v60 = vpop.f32.mrf.mxu1  ;;  %v346_v45 = vmul.f32 0.5, %v973_v51  ;;  %v354_v49 = vmul.f32 0.5, %v976_v52 }
  0xef   :  { %v981_v61 = vadd.f32 %v716_v55, %v968_v34  ;;  %v984_v62 = vadd.f32 %v740_v56, %v968_v34  ;;  %816 = verf.f32 %v362_v57 }
  0xf0   :  { %v718_v63 = vpop.f32.mrf.mxu0  ;;  %v742_v0 = vpop.f32.mrf.mxu1  ;;  %818 = verf.f32 %v370_v58 }
  0xf1   :  { %v363_v1 = vmul.f32 0.70710677, %v981_v61  ;;  %v371_v2 = vmul.f32 0.70710677, %v984_v62  ;;  %v719_v3 = vadd.f32 %v718_v63, %v717_v59  ;;  %v743_v4 = vadd.f32 %v742_v0, %v741_v60 }
  0xf2   :  { %v720_v5 = vpop.f32.mrf.mxu0  ;;  %v744_v6 = vpop.f32.mrf.mxu1  ;;  %v347_v56 = vmul.f32 0.5, %v981_v61 }
  0xf3   :  { %820 = verf.f32 %v363_v1  ;;  %v989_v7 = vadd.f32 %v719_v3, %v968_v34  ;;  %v992_v8 = vadd.f32 %v743_v4, %v968_v34 }
  0xf4   :  { %822 = verf.f32 %v371_v2  ;;  %v721_v9 = vpop.f32.mrf.mxu0  ;;  %v745_v10 = vpop.f32.mrf.mxu1  ;;  %v355_v2 = vmul.f32 0.5, %v984_v62 }
  0xf5   :  { %v722_v11 = vadd.f32 %v721_v9, %v720_v5  ;;  %v746_v12 = vadd.f32 %v745_v10, %v744_v6  ;;  %v364_v13 = vmul.f32 0.70710677, %v989_v7  ;;  %v372_v14 = vmul.f32 0.70710677, %v992_v8 }
  0xf6   :  { %v723_v15 = vpop.f32.mrf.mxu0  ;;  %v747_v16 = vpop.f32.mrf.mxu1 }
  0xf7   :  { %v997_v17 = vadd.f32 %v722_v11, %v968_v34  ;;  %v1000_v18 = vadd.f32 %v746_v12, %v968_v34  ;;  %824 = verf.f32 %v364_v13 }
  0xf8   :  { %v813_v19 = vpop.eup %812  ;;  %v724_v20 = vpop.f32.mrf.mxu0  ;;  %826 = verf.f32 %v372_v14 }
  0xf9   :  { %v748_v21 = vpop.f32.mrf.mxu1  ;;  %v815_v22 = vpop.eup %814  ;;  %v393_v24 = vadd.f32 1.0, %v813_v19  ;;  %v365_v25 = vmul.f32 0.70710677, %v997_v17  ;;  %v373_v28 = vmul.f32 0.70710677, %v1000_v18  ;;  %v725_v29 = vadd.f32 %v724_v20, %v723_v15 }
  0xfa   :  { %v401_v27 = vadd.f32 1.0, %v815_v22  ;;  %v726_v30 = vpop.f32.mrf.mxu0  ;;  %v749_v33 = vadd.f32 %v748_v21, %v747_v16  ;;  %v348_v16 = vmul.f32 0.5, %v989_v7  ;;  %v356_v20 = vmul.f32 0.5, %v992_v8 }
  0xfb   :  { %v750_v31 = vpop.f32.mrf.mxu1  ;;  %v1004_v32 = vmul.f32 %v393_v24, %v345_v23  ;;  %828 = verf.f32 %v365_v25  ;;  %v1009_v36 = vadd.f32 %v725_v29, %v968_v34  ;;  %v349_v8 = vmul.f32 0.5, %v997_v17 }
  0xfc   :  { %v1006_v35 = vmul.f32 %v401_v27, %v353_v26  ;;  %830 = verf.f32 %v373_v28  ;;  %v727_v37 = vpop.f32.mrf.mxu0  ;;  %v817_v39 = vpop.eup %816  ;;  %v1014_v41 = vadd.f32 %v749_v33, %v968_v34 }
  0xfd   :  { %v751_v38 = vpop.f32.mrf.mxu1  ;;  %v676_v40 = vpack.c.bf16 %v1004_v32, %v1004_v32  ;;  %v728_v42 = vadd.f32 %v727_v37, %v726_v30  ;;  %v819_v43 = vpop.eup %818  ;;  %v394_v46 = vadd.f32 1.0, %v817_v39  ;;  %v366_v53 = vmul.f32 0.70710677, %v1009_v36 }
  0xfe   :  { %v684_v44 = vpack.c.bf16 %v1006_v35, %v1006_v35  ;;  %v729_v47 = vpop.f32.mrf.mxu0  ;;  %v402_v50 = vadd.f32 1.0, %v819_v43  ;;  %v374_v54 = vmul.f32 0.70710677, %v1014_v41  ;;  %v752_v58 = vadd.f32 %v751_v38, %v750_v31 }
  0xff   :  { %v753_v48 = vpop.f32.mrf.mxu1  ;;  %490 = vst.msk [vmem:[%s1247_s3] sm:$0xf] %vm489_vm0, %v676_v40  ;;  %v1030_v51 = vmul.f32 %v394_v46, %v346_v45  ;;  %v1034_v57 = vadd.f32 %v728_v42, %v968_v34  ;;  %832 = verf.f32 %v366_v53  ;;  %v357_v30 = vmul.f32 0.5, %v1000_v18 }
 0x100   :  { %v821_v55 = vpop.eup %820  ;;  %498 = vst.msk [vmem:[%s1247_s3 + $0x20] sm:$0xf] %vm489_vm0, %v684_v44  ;;  %v730_v52 = vpop.f32.mrf.mxu0  ;;  %v1036_v60 = vmul.f32 %v402_v50, %v354_v49  ;;  %834 = verf.f32 %v374_v54  ;;  %v1053_v10 = vadd.f32 %v752_v58, %v968_v34  ;;  %v350_v43 = vmul.f32 0.5, %v1009_v36 }
 0x101   :  { %v823_v59 = vpop.eup %822  ;;  %v395_v63 = vadd.f32 1.0, %v821_v55  ;;  %v731_v0 = vadd.f32 %v730_v52, %v729_v47  ;;  %v677_v1 = vpack.c.bf16 %v1030_v51, %v1030_v51  ;;  %v754_v4 = vpop.f32.mrf.mxu1  ;;  %v367_v9 = vmul.f32 0.70710677, %v1034_v57 }
 0x102   :  { %v403_v3 = vadd.f32 1.0, %v823_v59  ;;  %v685_v61 = vpack.c.bf16 %v1036_v60, %v1036_v60  ;;  %v755_v13 = vadd.f32 %v754_v4, %v753_v48  ;;  %v375_v22 = vmul.f32 0.70710677, %v1053_v10 }
 0x103   :  { %v1043_v5 = vmul.f32 %v395_v63, %v347_v56  ;;  %491 = vst.msk [vmem:[%s1247_s3 + $0x4] sm:$0xf] %vm489_vm0, %v677_v1  ;;  %v1062_v12 = vadd.f32 %v731_v0, %v968_v34  ;;  %836 = verf.f32 %v367_v9  ;;  %v508_v39 = vsel %vm506_vm1, %v1030_v51, 0.0 }
 0x104   :  { %v1049_v6 = vmul.f32 %v403_v3, %v355_v2  ;;  %v825_v62 = vpop.eup %824  ;;  %499 = vst.msk [vmem:[%s1247_s3 + $0x24] sm:$0xf] %vm489_vm0, %v685_v61  ;;  %v1081_v25 = vadd.f32 %v755_v13, %v968_v34  ;;  %838 = verf.f32 %v375_v22  ;;  %v507_v45 = vsel %vm506_vm1, %v1004_v32, 0.0 }
 0x105   :  { %v678_v11 = vpack.c.bf16 %v1043_v5, %v1043_v5  ;;  %v827_v14 = vpop.eup %826  ;;  %v396_v19 = vadd.f32 1.0, %v825_v62  ;;  %v368_v7 = vmul.f32 0.70710677, %v1062_v12  ;;  %v510_v46 = vsel %vm506_vm1, %v1043_v5, 0.0 }
 0x106   :  { %v686_v15 = vpack.c.bf16 %v1049_v6, %v1049_v6  ;;  %v404_v21 = vadd.f32 1.0, %v827_v14  ;;  %v376_v17 = vmul.f32 0.70710677, %v1081_v25  ;;  %v358_v47 = vmul.f32 0.5, %v1014_v41 }
 0x107   :  { %492 = vst.msk [vmem:[%s1247_s3 + $0x8] sm:$0xf] %vm489_vm0, %v678_v11  ;;  %v1077_v24 = vmul.f32 %v396_v19, %v348_v16  ;;  %840 = verf.f32 %v368_v7  ;;  %v509_v49 = vadd.f32 %v508_v39, %v507_v45  ;;  %v351_v59 = vmul.f32 0.5, %v1034_v57 }
 0x108   :  { %v829_v23 = vpop.eup %828  ;;  %500 = vst.msk [vmem:[%s1247_s3 + $0x28] sm:$0xf] %vm489_vm0, %v686_v15  ;;  %v1083_v27 = vmul.f32 %v404_v21, %v356_v20  ;;  %842 = verf.f32 %v376_v17  ;;  %v359_v61 = vmul.f32 0.5, %v1053_v10  ;;  %v352_v62 = vmul.f32 0.5, %v1062_v12 }
 0x109   :  { %v831_v26 = vpop.eup %830  ;;  %v397_v28 = vadd.f32 1.0, %v829_v23  ;;  %v679_v29 = vpack.c.bf16 %v1077_v24, %v1077_v24  ;;  %v512_v36 = vsel %vm506_vm1, %v1077_v24, 0.0  ;;  %v511_v54 = vadd.f32 %v510_v46, %v509_v49 }
 0x10a   :  { %v405_v31 = vadd.f32 1.0, %v831_v26  ;;  %v687_v33 = vpack.c.bf16 %v1083_v27, %v1083_v27  ;;  %v360_v22 = vmul.f32 0.5, %v1081_v25  ;;  %v522_v26 = vsel %vm506_vm1, %v1006_v35, 0.0 }
 0x10b   :  { %v1091_v37 = vmul.f32 %v397_v28, %v349_v8  ;;  %493 = vst.msk [vmem:[%s1247_s3 + $0xc] sm:$0xf] %vm489_vm0, %v679_v29  ;;  %v513_v52 = vadd.f32 %v512_v36, %v511_v54  ;;  %v524_v25 = vsel %vm506_vm1, %v1036_v60, 0.0  ;;  %v528_v17 = vsel %vm506_vm1, %v1083_v27, 0.0 }
 0x10c   :  { %v1097_v34 = vmul.f32 %v405_v31, %v357_v30  ;;  %501 = vst.msk [vmem:[%s1247_s3 + $0x2c] sm:$0xf] %vm489_vm0, %v687_v33  ;;  %v833_v38 = vpop.eup %832  ;;  %v526_v31 = vsel %vm506_vm1, %v1049_v6, 0.0 }
 0x10d   :  { %v680_v18 = vpack.c.bf16 %v1091_v37, %v1091_v37  ;;  %v835_v42 = vpop.eup %834  ;;  %v398_v44 = vadd.f32 1.0, %v833_v38  ;;  %v514_v58 = vsel %vm506_vm1, %v1091_v37, 0.0 }
 0x10e   :  { %v688_v40 = vpack.c.bf16 %v1097_v34, %v1097_v34  ;;  %v406_v48 = vadd.f32 1.0, %v835_v42  ;;  %v515_v3 = vadd.f32 %v514_v58, %v513_v52  ;;  %v530_v38 = vsel %vm506_vm1, %v1097_v34, 0.0 }
 0x10f   :  { %494 = vst.msk [vmem:[%s1247_s3 + $0x10] sm:$0xf] %vm489_vm0, %v680_v18  ;;  %v1124_v50 = vmul.f32 %v398_v44, %v350_v43 }
 0x110   :  { %502 = vst.msk [vmem:[%s1247_s3 + $0x30] sm:$0xf] %vm489_vm0, %v688_v40  ;;  %v1128_v53 = vmul.f32 %v406_v48, %v358_v47  ;;  %v837_v56 = vpop.eup %836 }
 0x111   :  { %v681_v55 = vpack.c.bf16 %v1124_v50, %v1124_v50  ;;  %v399_v63 = vadd.f32 1.0, %v837_v56  ;;  %v839_v0 = vpop.eup %838  ;;  %v516_v1 = vsel %vm506_vm1, %v1124_v50, 0.0 }
 0x112   :  { %v689_v41 = vpack.c.bf16 %v1128_v53, %v1128_v53  ;;  %v407_v9 = vadd.f32 1.0, %v839_v0  ;;  %v517_v57 = vadd.f32 %v516_v1, %v515_v3  ;;  %v532_v40 = vsel %vm506_vm1, %v1128_v53, 0.0 }
 0x113   :  { %495 = vst.msk [vmem:[%s1247_s3 + $0x14] sm:$0xf] %vm489_vm0, %v681_v55  ;;  %v415_v4 = vmul.f32 %v399_v63, %v351_v59 }
 0x114   :  { %503 = vst.msk [vmem:[%s1247_s3 + $0x34] sm:$0xf] %vm489_vm0, %v689_v41  ;;  %v841_v2 = vpop.eup %840  ;;  %v1150_v15 = vmul.f32 %v407_v9, %v359_v61 }
 0x115   :  { %v400_v11 = vadd.f32 1.0, %v841_v2  ;;  %v682_v13 = vpack.c.bf16 %v415_v4, %v415_v4  ;;  %v518_v14 = vsel %vm506_vm1, %v415_v4, 0.0  ;;  %v843_v19 = vpop.eup %842 }
 0x116   :  { %v519_v20 = vadd.f32 %v518_v14, %v517_v57  ;;  %v690_v10 = vpack.c.bf16 %v1150_v15, %v1150_v15  ;;  %v408_v23 = vadd.f32 1.0, %v843_v19  ;;  %v534_v43 = vsel %vm506_vm1, %v1150_v15, 0.0 }
 0x117   :  { %v416_v16 = vmul.f32 %v400_v11, %v352_v62  ;;  %496 = vst.msk [vmem:[%s1247_s3 + $0x18] sm:$0xf] %vm489_vm0, %v682_v13 }
 0x118   :  { %504 = vst.msk [vmem:[%s1247_s3 + $0x38] sm:$0xf] %vm489_vm0, %v690_v10  ;;  %v1170_v8 = vmul.f32 %v408_v23, %v360_v22 }
 0x119   :  { %v683_v21 = vpack.c.bf16 %v416_v16, %v416_v16  ;;  %v520_v12 = vsel %vm506_vm1, %v416_v16, 0.0 }
 0x11a   :  { %v521_v7 = vadd.f32 %v520_v12, %v519_v20  ;;  %v691_v29 = vpack.c.bf16 %v1170_v8, %v1170_v8  ;;  %v536_v45 = vsel %vm506_vm1, %v1170_v8, 0.0 }
 0x11b   :  { %497 = vst.msk [vmem:[%s1247_s3 + $0x1c] sm:$0xf] %vm489_vm0, %v683_v21 }
 0x11c   :  { %v523_v28 = vadd.f32 %v522_v26, %v521_v7  ;;  %505 = vst.msk [vmem:[%s1247_s3 + $0x3c] sm:$0xf] %vm489_vm0, %v691_v29 }
 0x11e   :  { %v525_v30 = vadd.f32 %v524_v25, %v523_v28 }
 0x120   :  { %v527_v33 = vadd.f32 %v526_v31, %v525_v30 }
 0x122   :  { %v529_v18 = vadd.f32 %v528_v17, %v527_v33 }
 0x124   :  { %v531_v39 = vadd.f32 %v530_v38, %v529_v18 }
 0x126   :  { %v533_v42 = vadd.f32 %v532_v40, %v531_v39 }
 0x128   :  { %v535_v44 = vadd.f32 %v534_v43, %v533_v42 }
 0x12a   :  { %v537_v46 = vadd.f32 %v536_v45, %v535_v44 }
 0x12c   :  { %v538_v47 = vrot.slane %v537_v46, 4 }
 0x12e   :  { %v539_v48 = vadd.f32 %v538_v47, %v537_v46 }
 0x130   :  { %v540_v49 = vrot.slane %v539_v48, 2 }
 0x132   :  { %v541_v36 = vadd.f32 %v540_v49, %v539_v48 }
 0x134   :  { %v542_v54 = vrot.slane %v541_v36, 1 }
 0x136   :  { %v543_v55 = vadd.f32 %v542_v54, %v541_v36 }
 0x138   :  { %v1192_v56 = vmul.f32 0.0078125, %v543_v55 }
 0x13a   :  { %v546_v58 = vsub.f32 %v1004_v32, %v1192_v56  ;;  %v547_v41 = vsub.f32 %v1030_v51, %v1192_v56  ;;  %v548_v52 = vsub.f32 %v1043_v5, %v1192_v56  ;;  %v549_v59 = vsub.f32 %v1077_v24, %v1192_v56 }
 0x13b   :  { %v550_v1 = vsub.f32 %v1091_v37, %v1192_v56  ;;  %v551_v3 = vsub.f32 %v1124_v50, %v1192_v56  ;;  %v552_v5 = vsub.f32 %v415_v4, %v1192_v56  ;;  %v553_v57 = vsub.f32 %v416_v16, %v1192_v56 }
 0x13c   :  { %v562_v63 = vmul.f32 %v546_v58, %v546_v58  ;;  %v563_v0 = vmul.f32 %v547_v41, %v547_v41  ;;  %v564_v2 = vmul.f32 %v548_v52, %v548_v52  ;;  %v565_v61 = vmul.f32 %v549_v59, %v549_v59 }
 0x13d   :  { %v566_v62 = vmul.f32 %v550_v1, %v550_v1  ;;  %v567_v13 = vmul.f32 %v551_v3, %v551_v3  ;;  %v554_v50 = vsub.f32 %v1006_v35, %v1192_v56  ;;  %v568_v19 = vmul.f32 %v552_v5, %v552_v5 }
 0x13e   :  { %v578_v32 = vsel %vm506_vm1, %v562_v63, 0.0  ;;  %v579_v51 = vsel %vm506_vm1, %v563_v0, 0.0  ;;  %v581_v24 = vsel %vm506_vm1, %v564_v2, 0.0  ;;  %v583_v37 = vsel %vm506_vm1, %v565_v61, 0.0 }
 0x13f   :  { %v580_v9 = vadd.f32 %v579_v51, %v578_v32  ;;  %v585_v20 = vsel %vm506_vm1, %v566_v62, 0.0  ;;  %v555_v4 = vsub.f32 %v1036_v60, %v1192_v56  ;;  %v569_v21 = vmul.f32 %v553_v57, %v553_v57 }
 0x140   :  { %v587_v12 = vsel %vm506_vm1, %v567_v13, 0.0  ;;  %v556_v16 = vsub.f32 %v1049_v6, %v1192_v56  ;;  %v570_v23 = vmul.f32 %v554_v50, %v554_v50  ;;  %v589_v7 = vsel %vm506_vm1, %v568_v19, 0.0 }
 0x141   :  { %v582_v11 = vadd.f32 %v581_v24, %v580_v9  ;;  %v557_v35 = vsub.f32 %v1083_v27, %v1192_v56  ;;  %v571_v28 = vmul.f32 %v555_v4, %v555_v4  ;;  %v591_v25 = vsel %vm506_vm1, %v569_v21, 0.0 }
 0x142   :  { %v558_v60 = vsub.f32 %v1097_v34, %v1192_v56  ;;  %v572_v30 = vmul.f32 %v556_v16, %v556_v16  ;;  %v593_v31 = vsel %vm506_vm1, %v570_v23, 0.0  ;;  %v559_v6 = vsub.f32 %v1128_v53, %v1192_v56 }
 0x143   :  { %v584_v14 = vadd.f32 %v583_v37, %v582_v11  ;;  %v573_v17 = vmul.f32 %v557_v35, %v557_v35  ;;  %v595_v18 = vsel %vm506_vm1, %v571_v28, 0.0  ;;  %v560_v27 = vsub.f32 %v1150_v15, %v1192_v56 }
 0x144   :  { %v574_v39 = vmul.f32 %v558_v60, %v558_v60  ;;  %v597_v40 = vsel %vm506_vm1, %v572_v30, 0.0  ;;  %v561_v34 = vsub.f32 %v1170_v8, %v1192_v56  ;;  %v575_v43 = vmul.f32 %v559_v6, %v559_v6 }
 0x145   :  { %v586_v10 = vadd.f32 %v585_v20, %v584_v14  ;;  %v599_v44 = vsel %vm506_vm1, %v573_v17, 0.0  ;;  %v576_v46 = vmul.f32 %v560_v27, %v560_v27 }
 0x146   :  { %v601_v53 = vsel %vm506_vm1, %v574_v39, 0.0  ;;  %v577_v48 = vmul.f32 %v561_v34, %v561_v34  ;;  %v603_v49 = vsel %vm506_vm1, %v575_v43, 0.0 }
 0x147   :  { %v588_v22 = vadd.f32 %v587_v12, %v586_v10  ;;  %v605_v15 = vsel %vm506_vm1, %v576_v46, 0.0 }
 0x148   :  { %v607_v55 = vsel %vm506_vm1, %v577_v48, 0.0 }
 0x149   :  { %v590_v26 = vadd.f32 %v589_v7, %v588_v22 }
 0x14b   :  { %v592_v29 = vadd.f32 %v591_v25, %v590_v26 }
 0x14d   :  { %v594_v33 = vadd.f32 %v593_v31, %v592_v29 }
 0x14f   :  { %v596_v38 = vadd.f32 %v595_v18, %v594_v33 }
 0x151   :  { %v598_v42 = vadd.f32 %v597_v40, %v596_v38 }
 0x153   :  { %v600_v45 = vadd.f32 %v599_v44, %v598_v42 }
 0x155   :  { %v602_v47 = vadd.f32 %v601_v53, %v600_v45 }
 0x157   :  { %v604_v36 = vadd.f32 %v603_v49, %v602_v47 }
 0x159   :  { %v606_v54 = vadd.f32 %v605_v15, %v604_v36 }
 0x15b   :  { %v608_v58 = vadd.f32 %v607_v55, %v606_v54 }
 0x15d   :  { %v609_v41 = vrot.slane %v608_v58, 4 }
 0x15f   :  { %v610_v8 = vadd.f32 %v609_v41, %v608_v58 }
 0x161   :  { %v611_v52 = vrot.slane %v610_v8, 2 }
 0x163   :  { %v612_v59 = vadd.f32 %v611_v52, %v610_v8 }
 0x165   :  { %v613_v63 = vrot.slane %v612_v59, 1 }
 0x167   :  { %v614_v0 = vadd.f32 %v613_v63, %v612_v59 }
 0x169   :  { %v616_v1 = vsel %vm615_vm2, %v1192_v56, %v614_v0 }
 0x16a   :  { %618 = vst.msk [vmem:[%s1248_s4] sm:$0x3] %vm617_vm3, %v616_v1 }

// kernel: convmixer_forward.11
= control target key start
LH: loop header
LB: loop body
LE: loop exit
PB: predicated region body
PF: predicated region fallthrough
CT: control target
= control target key end

     0   :  { %v293_v1 = vmov 0.0   ;;  %vm294_vm0 = vmmov 0   ;;  %s385_s0 = inlined_call_operand.vmem [shape: bf16[2,64,32], index: 0, kind: input, shape index: {}]   ;;  %s386_s1 = inlined_call_operand.vmem [shape: f32[1,32], index: 1, kind: input, shape index: {}]   ;;  %s387_s2 = inlined_call_operand.vmem [shape: f32[1,32], index: 2, kind: input, shape index: {}]   ;;  %s388_s3 = inlined_call_operand.vmem [shape: bf16[32,10], index: 3, kind: input, shape index: {}]   ;;  %s389_s4 = inlined_call_operand.vmem [shape: f32[1,10], index: 4, kind: input, shape index: {}]   ;;  %s390_s5 = inlined_call_operand.hbm [shape: f32[2,10], index: 5, kind: output, shape index: {}]  }
   0x1   :  { %v269_v0 = vld [vmem:[%s388_s3 + $0x8] sm:$0xff]   ;;  %258 = vmatprep.subr.bf16.mxu0 %v293_v1  ;;  %v270_v2 = vld [vmem:[%s388_s3] sm:$0xff]   ;;  %262 = vmatprep.mubr.msk.bf16.mxu0 %vm294_vm0, %v293_v1  ;;  %v249_v8 = vld [vmem:[%s385_s0 + $0x10] sm:$0xff]  }
   0x2   :  { %259 = vmatpush3.bf16.msra.mxu0 %v269_v0  ;;  %v217_v3 = vld [vmem:[%s385_s0] sm:$0xff]   ;;  %v248_v4 = vld [vmem:[%s385_s0 + $0x8] sm:$0xff]   ;;  %v253_v15 = vld [vmem:[%s385_s0 + $0x30] sm:$0xff]  }
   0x3   :  { %260 = vmatprep.subr.bf16.mxu0 %v293_v1  ;;  %v218_v5 = vunpack.c.l.bf16 %v217_v3  ;;  %v219_v6 = vunpack.c.h.bf16 %v217_v3  ;;  %v222_v7 = vunpack.c.l.bf16 %v248_v4  ;;  %v251_v9 = vld [vmem:[%s385_s0 + $0x20] sm:$0xff]   ;;  %v252_v10 = vld [vmem:[%s385_s0 + $0x28] sm:$0xff]   ;;  %v223_v11 = vunpack.c.h.bf16 %v248_v4 }
   0x4   :  { %v234_v12 = vunpack.c.l.bf16 %v251_v9  ;;  %v235_v13 = vunpack.c.h.bf16 %v251_v9  ;;  %v238_v14 = vunpack.c.l.bf16 %v252_v10 }
   0x5   :  { %10 = vsyncpa [#allocation3], 0  ;;  %v226_v16 = vunpack.c.l.bf16 %v249_v8  ;;  %vm54_vm1 = vcmask 261120   ;;  %v239_v17 = vunpack.c.h.bf16 %v252_v10  ;;  %v227_v21 = vunpack.c.h.bf16 %v249_v8  ;;  %v250_v22 = vld [vmem:[%s385_s0 + $0x18] sm:$0xff]   ;;  %v211_v9 = vld [vmem:[%s387_s2] ss:$0 sm:$0xff] }
   0x6   :  { %261 = vmatpush3.bf16.msra.mxu0 %v270_v2  ;;  %v55_v18 = vsel %vm54_vm1, %v218_v5, 0.0  ;;  %v56_v19 = vsel %vm54_vm1, %v219_v6, 0.0  ;;  %v58_v20 = vsel %vm54_vm1, %v222_v7, 0.0  ;;  %v242_v23 = vunpack.c.l.bf16 %v253_v15  ;;  %v254_v29 = vld [vmem:[%s385_s0 + $0x38] sm:$0xff]   ;;  %v210_v6 = vld [vmem:[%s386_s1] ss:$0 sm:$0xff] }
   0x7   :  { %v57_v24 = vadd.f32 %v56_v19, %v55_v18  ;;  %v60_v25 = vsel %vm54_vm1, %v223_v11, 0.0  ;;  %v76_v26 = vsel %vm54_vm1, %v234_v12, 0.0  ;;  %v77_v27 = vsel %vm54_vm1, %v235_v13, 0.0  ;;  %s295_s16 = smov [#allocation2]  }
   0x8   :  { %v79_v28 = vsel %vm54_vm1, %v238_v14, 0.0  ;;  %v78_v31 = vadd.f32 %v77_v27, %v76_v26  ;;  %v230_v32 = vunpack.c.l.bf16 %v250_v22  ;;  %v243_v33 = vunpack.c.h.bf16 %v253_v15  ;;  %s202_s17 = sshll.u32 %s295_s16, 4  ;;  %s203_s17 = int_to_ptr.vmem [resolvable:$true] %s202_s17 }
   0x9   :  { %v59_v30 = vadd.f32 %v58_v20, %v57_v24  ;;  %v62_v34 = vsel %vm54_vm1, %v226_v16, 0.0  ;;  %v81_v35 = vsel %vm54_vm1, %v239_v17, 0.0  ;;  %v231_v38 = vunpack.c.h.bf16 %v250_v22  ;;  %v212_v20 = vld [vmem:[%s389_s4] ss:$0 sm:$0xff]  ;;  %s271_s2 = scalar_lea.vmem %s203_s17, 32  ;;  %p276_p1 = scmp.lt.s32.totalorder %s203_s17, %s203_s17 }
   0xa   :  { %v80_v37 = vadd.f32 %v79_v28, %v78_v31  ;;  %v246_v39 = vunpack.c.l.bf16 %v254_v29  ;;  %v64_v40 = vsel %vm54_vm1, %v227_v21, 0.0  ;;  %v83_v41 = vsel %vm54_vm1, %v242_v23, 0.0  ;;  %p272_p0 = scmp.ne.s32.totalorder %s203_s17, %s271_s2  ;;  %p277_p2 = scmp.lt.s32.totalorder %s271_s2, %s271_s2 }
   0xb   :  { %v61_v36 = vadd.f32 %v60_v25, %v59_v30  ;;  %v247_v44 = vunpack.c.h.bf16 %v254_v29  ;;  %v66_v45 = vsel %vm54_vm1, %v230_v32, 0.0  ;;  %v85_v46 = vsel %vm54_vm1, %v243_v33, 0.0 }
   0xc   :  { %v82_v43 = vadd.f32 %v81_v35, %v80_v37  ;;  %v68_v49 = vsel %vm54_vm1, %v231_v38, 0.0  ;;  %v87_v50 = vsel %vm54_vm1, %v246_v39, 0.0  ;;  %vm136_vm2 = vcmask 1041409   ;;  %p278_p3 = por %p277_p2, %p276_p1 }
   0xd   :  { %v63_v42 = vadd.f32 %v62_v34, %v61_v36  ;;  %v89_v53 = vsel %vm54_vm1, %v247_v44, 0.0  ;;  %vm194_vm3 = vcmask 74752  }
   0xe   :  { %v84_v48 = vadd.f32 %v83_v41, %v82_v43  ;;  %p279_p4 = pnand %p278_p3, %p272_p0 }
   0xf   :  { %v65_v47 = vadd.f32 %v64_v40, %v63_v42 }
  0x10   :  { %v86_v52 = vadd.f32 %v85_v46, %v84_v48 }
  0x11   :  { %v67_v51 = vadd.f32 %v66_v45, %v65_v47 }
  0x12   :  { %v88_v55 = vadd.f32 %v87_v50, %v86_v52 }
  0x13   :  { %v69_v54 = vadd.f32 %v68_v49, %v67_v51 }
  0x14   :  { %v90_v57 = vadd.f32 %v89_v53, %v88_v55 }
  0x15   :  { %v70_v56 = vrot.slane %v69_v54, 4 }
  0x16   :  { %v91_v59 = vrot.slane %v90_v57, 4 }
  0x17   :  { %v71_v58 = vadd.f32 %v70_v56, %v69_v54 }
  0x18   :  { %v92_v61 = vadd.f32 %v91_v59, %v90_v57 }
  0x19   :  { %v72_v60 = vrot.slane %v71_v58, 2 }
  0x1a   :  { %v93_v63 = vrot.slane %v92_v61, 2 }
  0x1b   :  { %v73_v62 = vadd.f32 %v72_v60, %v71_v58 }
  0x1c   :  { %v94_v1 = vadd.f32 %v93_v63, %v92_v61 }
  0x1d   :  { %v74_v0 = vrot.slane %v73_v62, 1 }
  0x1e   :  { %v95_v3 = vrot.slane %v94_v1, 1 }
  0x1f   :  { %v75_v2 = vadd.f32 %v74_v0, %v73_v62 }
  0x20   :  { %v96_v4 = vadd.f32 %v95_v3, %v94_v1 }
  0x21   :  { %v98_v5 = vmul.f32 0.015625, %v75_v2 }
  0x22   :  { %v99_v7 = vmul.f32 0.015625, %v96_v4 }
  0x23   :  { %v107_v8 = vmul.f32 %v210_v6, %v98_v5 }
  0x24   :  { %v108_v10 = vmul.f32 %v210_v6, %v99_v7 }
  0x25   :  { %v116_v11 = vadd.f32 %v211_v9, %v107_v8 }
  0x26   :  { %v117_v12 = vadd.f32 %v211_v9, %v108_v10 }
  0x27   :  { %v118_v13 = vpack.c.bf16 %v116_v11, %v116_v11 }
  0x28   :  { %v119_v14 = vpack.c.bf16 %v117_v12, %v117_v12 }
  0x29   :  { %v133_v15 = vunpack.c.l.b16 %v118_v13 }
  0x2a   :  { %v134_v16 = vunpack.c.l.b16 %v119_v14 }
  0x2c   :  { %v135_v17 = vrot.slane %v134_v16, 7 }
  0x2e   :  { %v137_v18 = vsel %vm136_vm2, %v135_v17, %v133_v15 }
  0x2f   :  { %v138_v19 = vpack.c.b16 %v137_v18, %v137_v18 }
  0x31   :  { %263 = vmatmul.mubr.msk.bf16.vlgmr.msra.gmra.mxu0 %vm54_vm1, %v138_v19 }
  0xf1   :  { %v188_v21 = vpop.f32.mrf.mxu0 }
  0xf2   :  { %v189_v22 = vadd.f32 %v212_v20, %v188_v21 }
  0xf3   :  { %v264_v23 = vpop.f32.mrf.mxu0 }
  0xf4   :  { %195 = vst.msk [vmem:[#allocation2] sm:$0x3] %vm194_vm3, %v189_v22 }
  0xf5   :  { %v191_v24 = vpop.f32.mrf.mxu0 }
  0xf6   :  { %282 = shalt.err (!%p279_p4)
}
  0xf7   :  { %205 = dma.vmem_to_hbm [thread:$0]  %s203_s17, 32, %s390_s5, [#allocation3]   ;;  %v265_v25 = vpop.f32.mrf.mxu0 }
  0xf8   :  { %291 = dma.done.wait [#allocation3], 32  }
  0xf9   :  { %292 = vsyncadd [#allocation3], 4294967264 }
  0xfa   :  { %209 = vsyncpa [#allocation3], 1 }

// kernel: convmixer_forward.7
= control target key start
LH: loop header
LB: loop body
LE: loop exit
PB: predicated region body
PF: predicated region fallthrough
CT: control target
= control target key end

     0   :  { %s891_s21 = smov 0   ;;  %s1129_s0 = inlined_call_operand.vmem [shape: bf16[2,8,8,32], index: 0, kind: input, shape index: {}]   ;;  %s1130_s1 = inlined_call_operand.vmem [shape: f32[1,32], index: 1, kind: input, shape index: {}]   ;;  %s1131_s2 = inlined_call_operand.vmem [shape: f32[1,32], index: 2, kind: input, shape index: {}]   ;;  %s1132_s3 = inlined_call_operand.vmem [shape: f32[9,8,32], index: 3, kind: input, shape index: {}]   ;;  %s1133_s4 = inlined_call_operand.vmem [shape: f32[1,32], index: 4, kind: input, shape index: {}]   ;;  %s1134_s5 = inlined_call_operand.vmem [shape: bf16[2,8,8,32], index: 5, kind: output, shape index: {0}]   ;;  %s1135_s6 = inlined_call_operand.vmem [shape: f32[2,2,32], index: 6, kind: output, shape index: {1}]  }
   0x1 LB: > { %s778_s22 = sadd.s32 4294967295, %s853_s21   ;;  %p782_p0 = scmp.ge.s32.totalorder %s853_s21, 1  ;;  %s853_s21 = sphi %s891_s21, %s17_s21  }
   0x2   : > { %p215_p1 = scmp.lt.s32.totalorder %s853_s21, 3 }
   0x4   : > { %p216_p2 = pnand %p782_p0, %p215_p1 }
   0x5   : > { %p249_p3 = scmp.lt.s32.totalorder (!%p216_p2), %s778_s22, 1 }
   0x6   : > { %219 = sbr.rel (%p216_p2) target bundleno = 152 (0x98), region = 40 }
   0xb   : > { %vm309_vm0 = vcmask 261120   ;;  %v855_v0 = vmov 0.0   ;;  %s1137_s22 = smov (!%p249_p3, %s778_s22), 1  ;;  %v788_v1 = vld [vmem:[%s1130_s1] ss:$0 sm:$0xff]  ;;  %v918_v24 = vld [vmem:[%s1132_s3 + $0x8] sm:$0xff] }
   0xc   : > { %310 = vst.msk [vmem:[#allocation2] sm:$0xff] %vm309_vm0, %v855_v0  ;;  %312 = vst.msk [vmem:[#allocation2 + $0x48] sm:$0xff] %vm309_vm0, %v855_v0  ;;  %s801_s23 = sshll.u32 %s1137_s22, 5  ;;  %v789_v10 = vld [vmem:[%s1131_s2] ss:$0 sm:$0xff]  ;;  %v937_v37 = vld [vmem:[%s1132_s3 + $0x10] sm:$0xff] }
   0xd   : > { %s253_s26 = scalar_lea.vmem %s1129_s0, %s801_s23  ;;  %v923_v33 = vld [vmem:[%s1132_s3] sm:$0xff]  ;;  %v944_v41 = vld [vmem:[%s1132_s3 + $0x18] sm:$0xff]  ;;  %v954_v48 = vld [vmem:[%s1132_s3 + $0x28] sm:$0xff]  ;;  %vm619_vm1 = vcmask 257024   ;;  %s1057_s8 = scalar_lea.vmem %s1134_s5, %s801_s23  ;;  %vm688_vm2 = vcmask 1040384   ;;  %vm690_vm3 = vcmask 254976  }
   0xe   : > { %v804_v2 = vld [vmem:[%s253_s26] sm:$0xff]   ;;  %v819_v3 = vld [vmem:[%s253_s26 + $0x8] sm:$0xff]   ;;  %v820_v4 = vld [vmem:[%s253_s26 + $0x10] sm:$0xff]   ;;  %s787_s23 = sshll.u32 %s1137_s22, 1 }
   0xf   : > { %v805_v5 = vunpack.c.l.bf16 %v804_v2  ;;  %v806_v6 = vunpack.c.h.bf16 %v804_v2  ;;  %v809_v7 = vunpack.c.l.bf16 %v819_v3  ;;  %v810_v8 = vunpack.c.h.bf16 %v819_v3  ;;  %v821_v9 = vld [vmem:[%s253_s26 + $0x18] sm:$0xff]   ;;  %v949_v44 = vld [vmem:[%s1132_s3 + $0x20] sm:$0xff]  ;;  %v959_v49 = vld [vmem:[%s1132_s3 + $0x30] sm:$0xff]  ;;  %s262_s11 = scalar_lea.vmem %s1135_s6, %s787_s23 }
  0x10   : > { %v813_v11 = vunpack.c.l.bf16 %v820_v4  ;;  %v814_v12 = vunpack.c.h.bf16 %v820_v4  ;;  %v817_v13 = vunpack.c.l.bf16 %v821_v9  ;;  %v818_v14 = vunpack.c.h.bf16 %v821_v9  ;;  %v964_v50 = vld [vmem:[%s1132_s3 + $0x38] sm:$0xff]  ;;  %v969_v53 = vld [vmem:[%s1132_s3 + $0x40] sm:$0xff] }
  0x11   : > { %v286_v15 = vmul.f32 %v805_v5, %v788_v1  ;;  %v287_v16 = vmul.f32 %v806_v6, %v788_v1  ;;  %v288_v17 = vmul.f32 %v809_v7, %v788_v1  ;;  %v289_v18 = vmul.f32 %v810_v8, %v788_v1 }
  0x12   : > { %v290_v20 = vmul.f32 %v813_v11, %v788_v1  ;;  %v291_v21 = vmul.f32 %v814_v12, %v788_v1  ;;  %v292_v22 = vmul.f32 %v817_v13, %v788_v1  ;;  %v293_v23 = vmul.f32 %v818_v14, %v788_v1 }
  0x13   : > { %v322_v19 = vld [vmem:[#allocation2] sm:$0xff]  ;;  %v301_v25 = vadd.f32 %v789_v10, %v286_v15  ;;  %v302_v26 = vadd.f32 %v789_v10, %v287_v16  ;;  %v303_v27 = vadd.f32 %v789_v10, %v288_v17  ;;  %v304_v28 = vadd.f32 %v789_v10, %v289_v18 }
  0x14   : > { %v305_v29 = vadd.f32 %v789_v10, %v290_v20  ;;  %v306_v30 = vadd.f32 %v789_v10, %v291_v21  ;;  %v307_v31 = vadd.f32 %v789_v10, %v292_v22  ;;  %v308_v32 = vadd.f32 %v789_v10, %v293_v23 }
  0x15   : > { %314 = vst.msk [vmem:[#allocation2 + $0x8] sm:$0xff] %vm309_vm0, %v301_v25  ;;  %315 = vst.msk [vmem:[#allocation2 + $0x10] sm:$0xff] %vm309_vm0, %v302_v26  ;;  %v330_v34 = vrot.slane %v322_v19, 7  ;;  %v357_v35 = vmul.f32 %v918_v24, %v322_v19  ;;  %v373_v36 = vrot.slane %v322_v19, 1 }
  0x16   : > { %316 = vst.msk [vmem:[#allocation2 + $0x18] sm:$0xff] %vm309_vm0, %v303_v27  ;;  %317 = vst.msk [vmem:[#allocation2 + $0x20] sm:$0xff] %vm309_vm0, %v304_v28 }
  0x17   : > { %318 = vst.msk [vmem:[#allocation2 + $0x28] sm:$0xff] %vm309_vm0, %v305_v29  ;;  %319 = vst.msk [vmem:[#allocation2 + $0x30] sm:$0xff] %vm309_vm0, %v306_v30  ;;  %v339_v38 = vmul.f32 %v923_v33, %v330_v34  ;;  %v383_v40 = vmul.f32 %v937_v37, %v373_v36 }
  0x18   : > { %320 = vst.msk [vmem:[#allocation2 + $0x38] sm:$0xff] %vm309_vm0, %v307_v31  ;;  %321 = vst.msk [vmem:[#allocation2 + $0x40] sm:$0xff] %vm309_vm0, %v308_v32 }
  0x19   : > { %v365_v39 = vadd.f32 %v357_v35, %v339_v38 }
  0x1b   : > { %v391_v45 = vadd.f32 %v383_v40, %v365_v39  ;;  %v1000_v40 = vld [vmem:[%s1133_s4] ss:$0 sm:$0xff] }
  0x1c   : > { %v323_v42 = vld [vmem:[#allocation2 + $0x8] sm:$0xff]  ;;  %v324_v43 = vld [vmem:[#allocation2 + $0x10] sm:$0xff] }
  0x1d   : > { %v407_v46 = vrot.slane %v323_v42, 7  ;;  %v451_v47 = vrot.slane %v323_v42, 1  ;;  %v486_v51 = vrot.slane %v324_v43, 7  ;;  %v530_v52 = vrot.slane %v324_v43, 1  ;;  %v325_v54 = vld [vmem:[#allocation2 + $0x18] sm:$0xff]  ;;  %v326_v7 = vld [vmem:[#allocation2 + $0x20] sm:$0xff] }
  0x1e   : > { %v435_v56 = vmul.f32 %v949_v44, %v323_v42  ;;  %v358_v58 = vmul.f32 %v918_v24, %v323_v42  ;;  %v514_v61 = vmul.f32 %v964_v50, %v324_v43  ;;  %v436_v62 = vmul.f32 %v949_v44, %v324_v43  ;;  %v327_v34 = vld [vmem:[#allocation2 + $0x28] sm:$0xff] }
  0x1f   : > { %v417_v55 = vmul.f32 %v944_v41, %v407_v46  ;;  %v340_v57 = vmul.f32 %v407_v46, %v923_v33  ;;  %v461_v59 = vmul.f32 %v954_v48, %v451_v47  ;;  %v496_v60 = vmul.f32 %v959_v49, %v486_v51 }
  0x20   : > { %v540_v0 = vmul.f32 %v969_v53, %v530_v52  ;;  %v384_v2 = vmul.f32 %v937_v37, %v451_v47  ;;  %v487_v3 = vrot.slane %v325_v54, 7  ;;  %v341_v4 = vmul.f32 %v486_v51, %v923_v33 }
  0x21   : > { %v425_v63 = vadd.f32 %v417_v55, %v391_v45  ;;  %v366_v1 = vadd.f32 %v358_v58, %v340_v57  ;;  %v359_v5 = vmul.f32 %v918_v24, %v324_v43  ;;  %v385_v6 = vmul.f32 %v937_v37, %v530_v52 }
  0x22   : > { %v418_v10 = vmul.f32 %v944_v41, %v486_v51  ;;  %v531_v11 = vrot.slane %v325_v54, 1  ;;  %v462_v12 = vmul.f32 %v954_v48, %v530_v52  ;;  %v515_v13 = vmul.f32 %v964_v50, %v325_v54 }
  0x23   : > { %v443_v8 = vadd.f32 %v435_v56, %v425_v63  ;;  %v392_v9 = vadd.f32 %v384_v2, %v366_v1  ;;  %v367_v14 = vadd.f32 %v359_v5, %v341_v4  ;;  %v419_v15 = vmul.f32 %v944_v41, %v487_v3 }
  0x24   : > { %v497_v18 = vmul.f32 %v959_v49, %v487_v3  ;;  %v541_v19 = vmul.f32 %v969_v53, %v531_v11  ;;  %v488_v21 = vrot.slane %v326_v7, 7  ;;  %v342_v22 = vmul.f32 %v487_v3, %v923_v33  ;;  %v328_v3 = vld [vmem:[#allocation2 + $0x30] sm:$0xff] }
  0x25   : > { %v469_v16 = vadd.f32 %v461_v59, %v443_v8  ;;  %v426_v17 = vadd.f32 %v418_v10, %v392_v9  ;;  %v393_v20 = vadd.f32 %v385_v6, %v367_v14  ;;  %v360_v23 = vmul.f32 %v918_v24, %v325_v54 }
  0x26   : > { %v437_v27 = vmul.f32 %v949_v44, %v325_v54  ;;  %v386_v28 = vmul.f32 %v937_v37, %v531_v11  ;;  %v532_v30 = vrot.slane %v326_v7, 1  ;;  %v420_v32 = vmul.f32 %v944_v41, %v488_v21 }
  0x27   : > { %v504_v25 = vadd.f32 %v496_v60, %v469_v16  ;;  %v444_v26 = vadd.f32 %v436_v62, %v426_v17  ;;  %v427_v29 = vadd.f32 %v419_v15, %v393_v20  ;;  %v368_v31 = vadd.f32 %v360_v23, %v342_v22 }
  0x28   : > { %v463_v38 = vmul.f32 %v954_v48, %v531_v11  ;;  %v516_v39 = vmul.f32 %v964_v50, %v326_v7  ;;  %v498_v43 = vmul.f32 %v959_v49, %v488_v21  ;;  %v542_v45 = vmul.f32 %v969_v53, %v532_v30 }
  0x29   : > { %v522_v35 = vadd.f32 %v514_v61, %v504_v25  ;;  %v470_v36 = vadd.f32 %v462_v12, %v444_v26  ;;  %v445_v42 = vadd.f32 %v437_v27, %v427_v29  ;;  %v394_v46 = vadd.f32 %v386_v28, %v368_v31 }
  0x2a   : > { %v438_v52 = vmul.f32 %v949_v44, %v326_v7  ;;  %v343_v54 = vmul.f32 %v488_v21, %v923_v33  ;;  %v489_v57 = vrot.slane %v327_v34, 7  ;;  %v361_v58 = vmul.f32 %v918_v24, %v326_v7 }
  0x2b   : > { %v548_v47 = vadd.f32 %v540_v0, %v522_v35  ;;  %v505_v51 = vadd.f32 %v497_v18, %v470_v36  ;;  %v471_v55 = vadd.f32 %v463_v38, %v445_v42  ;;  %v428_v56 = vadd.f32 %v420_v32, %v394_v46  ;;  %v329_v32 = vld [vmem:[#allocation2 + $0x38] sm:$0xff] }
  0x2c   : > { %v464_v61 = vmul.f32 %v954_v48, %v532_v30  ;;  %v387_v62 = vmul.f32 %v937_v37, %v532_v30  ;;  %v369_v0 = vadd.f32 %v361_v58, %v343_v54  ;;  %v421_v2 = vmul.f32 %v944_v41, %v489_v57 }
  0x2d   : > { %v563_v59 = vadd.f32 %v1000_v40, %v548_v47  ;;  %v523_v60 = vadd.f32 %v515_v13, %v505_v51  ;;  %v506_v63 = vadd.f32 %v498_v43, %v471_v55  ;;  %v446_v1 = vadd.f32 %v438_v52, %v428_v56 }
  0x2e   : > { %v499_v6 = vmul.f32 %v959_v49, %v489_v57  ;;  %v533_v8 = vrot.slane %v327_v34, 1  ;;  %v395_v10 = vadd.f32 %v387_v62, %v369_v0  ;;  %v439_v11 = vmul.f32 %v949_v44, %v327_v34 }
  0x2f   : > { %v579_v4 = vmul.f32 0.70710677, %v563_v59  ;;  %v549_v5 = vadd.f32 %v541_v19, %v523_v60  ;;  %v524_v9 = vadd.f32 %v516_v39, %v506_v63  ;;  %v472_v7 = vadd.f32 %v464_v61, %v446_v1  ;;  %v484_v61 = vld [vmem:[#allocation2 + $0x40] sm:$0xff] }
  0x30   : > { %v517_v13 = vmul.f32 %v964_v50, %v327_v34  ;;  %v465_v14 = vmul.f32 %v954_v48, %v533_v8  ;;  %v429_v17 = vadd.f32 %v421_v2, %v395_v10  ;;  %v490_v18 = vrot.slane %v328_v3, 7 }
  0x31   : > { %831 = verf.f32 %v579_v4  ;;  %v564_v12 = vadd.f32 %v1000_v40, %v549_v5  ;;  %v550_v15 = vadd.f32 %v542_v45, %v524_v9  ;;  %v507_v16 = vadd.f32 %v499_v6, %v472_v7 }
  0x32   : > { %v543_v20 = vmul.f32 %v969_v53, %v533_v8  ;;  %v344_v21 = vmul.f32 %v489_v57, %v923_v33  ;;  %v447_v25 = vadd.f32 %v439_v11, %v429_v17  ;;  %v500_v26 = vmul.f32 %v959_v49, %v490_v18 }
  0x33   : > { %v580_v19 = vmul.f32 0.70710677, %v564_v12  ;;  %v1019_v22 = vadd.f32 %v1000_v40, %v550_v15  ;;  %v525_v23 = vadd.f32 %v517_v13, %v507_v16  ;;  %v362_v27 = vmul.f32 %v918_v24, %v327_v34 }
  0x34   : > { %v388_v28 = vmul.f32 %v937_v37, %v533_v8  ;;  %v473_v31 = vadd.f32 %v465_v14, %v447_v25  ;;  %v571_v35 = vmul.f32 0.5, %v563_v59  ;;  %v534_v36 = vrot.slane %v328_v3, 1 }
  0x35   : > { %833 = verf.f32 %v580_v19  ;;  %v581_v29 = vmul.f32 0.70710677, %v1019_v22  ;;  %v551_v30 = vadd.f32 %v543_v20, %v525_v23  ;;  %v370_v38 = vadd.f32 %v362_v27, %v344_v21 }
  0x36   : > { %v422_v39 = vmul.f32 %v944_v41, %v490_v18  ;;  %v508_v43 = vadd.f32 %v500_v26, %v473_v31  ;;  %v518_v45 = vmul.f32 %v964_v50, %v328_v3  ;;  %v544_v34 = vmul.f32 %v969_v53, %v534_v36  ;;  %v485_v26 = vld [vmem:[#allocation2 + $0x48] sm:$0xff] }
  0x37   : > { %835 = verf.f32 %v581_v29  ;;  %v1027_v42 = vadd.f32 %v1000_v40, %v551_v30  ;;  %v396_v46 = vadd.f32 %v388_v28, %v370_v38  ;;  %v440_v47 = vmul.f32 %v949_v44, %v328_v3 }
  0x38   : > { %v345_v51 = vmul.f32 %v490_v18, %v923_v33  ;;  %v526_v54 = vadd.f32 %v518_v45, %v508_v43  ;;  %v491_v55 = vrot.slane %v329_v32, 7  ;;  %v363_v56 = vmul.f32 %v918_v24, %v328_v3 }
  0x39   : > { %v582_v52 = vmul.f32 0.70710677, %v1027_v42  ;;  %v572_v57 = vmul.f32 0.5, %v564_v12  ;;  %v430_v58 = vadd.f32 %v422_v39, %v396_v46  ;;  %v466_v59 = vmul.f32 %v954_v48, %v534_v36 }
  0x3a   : > { %v389_v60 = vmul.f32 %v937_v37, %v534_v36  ;;  %v552_v62 = vadd.f32 %v544_v34, %v526_v54  ;;  %v371_v63 = vadd.f32 %v363_v56, %v345_v51  ;;  %v423_v1 = vmul.f32 %v944_v41, %v491_v55 }
  0x3b   : > { %837 = verf.f32 %v582_v52  ;;  %v448_v0 = vadd.f32 %v440_v47, %v430_v58  ;;  %v501_v2 = vmul.f32 %v959_v49, %v491_v55  ;;  %v535_v4 = vrot.slane %v329_v32, 1 }
  0x3c   : > { %v441_v5 = vmul.f32 %v949_v44, %v329_v32  ;;  %v1041_v3 = vadd.f32 %v1000_v40, %v552_v62  ;;  %v397_v8 = vadd.f32 %v389_v60, %v371_v63  ;;  %v492_v9 = vrot.slane %v484_v61, 7 }
  0x3d   : > { %v346_v7 = vmul.f32 %v491_v55, %v923_v33  ;;  %v474_v11 = vadd.f32 %v466_v59, %v448_v0  ;;  %v519_v12 = vmul.f32 %v964_v50, %v329_v32  ;;  %v364_v13 = vmul.f32 %v918_v24, %v329_v32 }
  0x3e   : > { %v832_v6 = vpop.eup %831  ;;  %v583_v14 = vmul.f32 0.70710677, %v1041_v3  ;;  %v545_v15 = vmul.f32 %v969_v53, %v535_v4  ;;  %v431_v16 = vadd.f32 %v423_v1, %v397_v8  ;;  %v467_v17 = vmul.f32 %v954_v48, %v535_v4 }
  0x3f   : > { %v595_v10 = vadd.f32 1.0, %v832_v6  ;;  %v509_v19 = vadd.f32 %v501_v2, %v474_v11  ;;  %v372_v20 = vadd.f32 %v364_v13, %v346_v7  ;;  %v390_v21 = vmul.f32 %v937_v37, %v535_v4 }
  0x40   : > { %839 = verf.f32 %v583_v14  ;;  %v449_v24 = vadd.f32 %v441_v5, %v431_v16  ;;  %v502_v23 = vmul.f32 %v959_v49, %v492_v9  ;;  %v424_v25 = vmul.f32 %v944_v41, %v492_v9 }
  0x41   : > { %v1049_v18 = vmul.f32 %v595_v10, %v571_v35  ;;  %v527_v37 = vadd.f32 %v519_v12, %v509_v19  ;;  %v536_v29 = vrot.slane %v484_v61, 1  ;;  %v520_v31 = vmul.f32 %v964_v50, %v484_v61 }
  0x42   : > { %v834_v33 = vpop.eup %833  ;;  %v475_v30 = vadd.f32 %v467_v17, %v449_v24  ;;  %v398_v32 = vadd.f32 %v390_v21, %v372_v20  ;;  %v442_v35 = vmul.f32 %v949_v44, %v484_v61  ;;  %v573_v41 = vmul.f32 0.5, %v1019_v22 }
  0x43   : > { %v611_v27 = vpack.c.bf16 %v1049_v18, %v1049_v18  ;;  %v596_v28 = vadd.f32 1.0, %v834_v33  ;;  %v553_v39 = vadd.f32 %v545_v15, %v527_v37  ;;  %v493_v43 = vrot.slane %v485_v26, 7 }
  0x44   : > { %v836_v36 = vpop.eup %835  ;;  %v510_v34 = vadd.f32 %v502_v23, %v475_v30  ;;  %v546_v46 = vmul.f32 %v969_v53, %v536_v29  ;;  %v432_v47 = vadd.f32 %v424_v25, %v398_v32  ;;  %v468_v52 = vmul.f32 %v954_v48, %v536_v29 }
  0x45   : > { %620 = vst.msk [vmem:[%s1057_s8] sm:$0xf] %vm619_vm1, %v611_v27  ;;  %v1067_v38 = vmul.f32 %v596_v28, %v572_v57  ;;  %v597_v45 = vadd.f32 1.0, %v836_v36  ;;  %v568_v44 = vadd.f32 %v1000_v40, %v553_v39  ;;  %v503_v58 = vmul.f32 %v959_v49, %v493_v43 }
  0x46   : > { %v528_v55 = vadd.f32 %v520_v31, %v510_v34  ;;  %v450_v56 = vadd.f32 %v442_v35, %v432_v47  ;;  %v537_v59 = vrot.slane %v485_v26, 1  ;;  %v574_v61 = vmul.f32 0.5, %v1027_v42 }
  0x47   : > { %v612_v51 = vpack.c.bf16 %v1067_v38, %v1067_v38  ;;  %v1075_v54 = vmul.f32 %v597_v45, %v573_v41  ;;  %v584_v57 = vmul.f32 0.70710677, %v568_v44  ;;  %v521_v1 = vmul.f32 %v964_v50, %v485_v26 }
  0x48   : > { %v838_v22 = vpop.eup %837  ;;  %v554_v48 = vadd.f32 %v546_v46, %v528_v55  ;;  %v476_v63 = vadd.f32 %v468_v52, %v450_v56  ;;  %v547_v49 = vmul.f32 %v969_v53, %v537_v59  ;;  %v629_v42 = vsel %vm309_vm0, %v1067_v38, 0.0 }
  0x49   : > { %621 = vst.msk [vmem:[%s1057_s8 + $0x4] sm:$0xf] %vm619_vm1, %v612_v51  ;;  %v613_v60 = vpack.c.bf16 %v1075_v54, %v1075_v54  ;;  %v598_v62 = vadd.f32 1.0, %v838_v22  ;;  %841 = verf.f32 %v584_v57  ;;  %v575_v50 = vmul.f32 0.5, %v1041_v3 }
  0x4a   : > { %v569_v2 = vadd.f32 %v1000_v40, %v554_v48  ;;  %v511_v4 = vadd.f32 %v503_v58, %v476_v63  ;;  %v628_v10 = vsel %vm309_vm0, %v1049_v18, 0.0  ;;  %v631_v15 = vsel %vm309_vm0, %v1075_v54, 0.0 }
  0x4b   : > { %622 = vst.msk [vmem:[%s1057_s8 + $0x8] sm:$0xf] %vm619_vm1, %v613_v60  ;;  %v606_v0 = vmul.f32 %v598_v62, %v574_v61  ;;  %v630_v12 = vadd.f32 %v629_v42, %v628_v10  ;;  %v576_v20 = vmul.f32 0.5, %v568_v44 }
  0x4c   : > { %v585_v6 = vmul.f32 0.70710677, %v569_v2  ;;  %v529_v9 = vadd.f32 %v521_v1, %v511_v4  ;;  %v577_v27 = vmul.f32 0.5, %v569_v2 }
  0x4d   : > { %v614_v5 = vpack.c.bf16 %v606_v0, %v606_v0  ;;  %v840_v8 = vpop.eup %839  ;;  %v632_v17 = vadd.f32 %v631_v15, %v630_v12  ;;  %v633_v19 = vsel %vm309_vm0, %v606_v0, 0.0 }
  0x4e   : > { %v599_v7 = vadd.f32 1.0, %v840_v8  ;;  %843 = verf.f32 %v585_v6  ;;  %v555_v11 = vadd.f32 %v547_v49, %v529_v9 }
  0x4f   : > { %623 = vst.msk [vmem:[%s1057_s8 + $0xc] sm:$0xf] %vm619_vm1, %v614_v5  ;;  %v634_v33 = vadd.f32 %v633_v19, %v632_v17 }
  0x50   : > { %v607_v53 = vmul.f32 %v599_v7, %v575_v50  ;;  %v570_v13 = vadd.f32 %v1000_v40, %v555_v11 }
  0x52   : > { %v615_v14 = vpack.c.bf16 %v607_v53, %v607_v53  ;;  %v586_v16 = vmul.f32 0.70710677, %v570_v13  ;;  %v635_v40 = vsel %vm309_vm0, %v607_v53, 0.0  ;;  %v578_v36 = vmul.f32 0.5, %v570_v13 }
  0x53   : > { %v636_v26 = vadd.f32 %v635_v40, %v634_v33 }
  0x54   : > { %624 = vst.msk [vmem:[%s1057_s8 + $0x10] sm:$0xf] %vm619_vm1, %v615_v14  ;;  %845 = verf.f32 %v586_v16 }
  0x56   : > { %v842_v3 = vpop.eup %841 }
  0x57   : > { %v600_v21 = vadd.f32 1.0, %v842_v3 }
  0x59   : > { %v608_v24 = vmul.f32 %v600_v21, %v576_v20 }
  0x5b   : > { %v844_v23 = vpop.eup %843  ;;  %v616_v25 = vpack.c.bf16 %v608_v24, %v608_v24  ;;  %v637_v29 = vsel %vm309_vm0, %v608_v24, 0.0 }
  0x5c   : > { %v601_v28 = vadd.f32 1.0, %v844_v23  ;;  %v638_v30 = vadd.f32 %v637_v29, %v636_v26 }
  0x5d   : > { %625 = vst.msk [vmem:[%s1057_s8 + $0x14] sm:$0xf] %vm619_vm1, %v616_v25 }
  0x5e   : > { %v609_v37 = vmul.f32 %v601_v28, %v577_v27 }
  0x60   : > { %v617_v31 = vpack.c.bf16 %v609_v37, %v609_v37  ;;  %v639_v35 = vsel %vm309_vm0, %v609_v37, 0.0 }
  0x61   : > { %v846_v32 = vpop.eup %845  ;;  %v640_v39 = vadd.f32 %v639_v35, %v638_v30 }
  0x62   : > { %626 = vst.msk [vmem:[%s1057_s8 + $0x18] sm:$0xf] %vm619_vm1, %v617_v31  ;;  %v602_v41 = vadd.f32 1.0, %v846_v32 }
  0x64   : > { %v610_v43 = vmul.f32 %v602_v41, %v578_v36 }
  0x66   : > { %v618_v45 = vpack.c.bf16 %v610_v43, %v610_v43  ;;  %v641_v34 = vsel %vm309_vm0, %v610_v43, 0.0 }
  0x67   : > { %v642_v46 = vadd.f32 %v641_v34, %v640_v39 }
  0x68   : > { %627 = vst.msk [vmem:[%s1057_s8 + $0x1c] sm:$0xf] %vm619_vm1, %v618_v45 }
  0x69   : > { %v643_v47 = vrot.slane %v642_v46, 4 }
  0x6b   : > { %v644_v51 = vadd.f32 %v643_v47, %v642_v46 }
  0x6d   : > { %v645_v44 = vrot.slane %v644_v51, 2 }
  0x6f   : > { %v646_v52 = vadd.f32 %v645_v44, %v644_v51 }
  0x71   : > { %v647_v55 = vrot.slane %v646_v52, 1 }
  0x73   : > { %v648_v56 = vadd.f32 %v647_v55, %v646_v52 }
  0x75   : > { %v650_v22 = vmul.f32 0.015625, %v648_v56 }
  0x77   : > { %v651_v57 = vsub.f32 %v1049_v18, %v650_v22  ;;  %v652_v58 = vsub.f32 %v1067_v38, %v650_v22  ;;  %v653_v59 = vsub.f32 %v1075_v54, %v650_v22  ;;  %v654_v60 = vsub.f32 %v606_v0, %v650_v22 }
  0x78   : > { %v655_v61 = vsub.f32 %v607_v53, %v650_v22  ;;  %v656_v1 = vsub.f32 %v608_v24, %v650_v22  ;;  %v657_v6 = vsub.f32 %v609_v37, %v650_v22  ;;  %v658_v38 = vsub.f32 %v610_v43, %v650_v22 }
  0x79   : > { %v659_v62 = vmul.f32 %v651_v57, %v651_v57  ;;  %v660_v48 = vmul.f32 %v652_v58, %v652_v58  ;;  %v661_v63 = vmul.f32 %v653_v59, %v653_v59  ;;  %v662_v2 = vmul.f32 %v654_v60, %v654_v60 }
  0x7a   : > { %v663_v8 = vmul.f32 %v655_v61, %v655_v61  ;;  %v664_v9 = vmul.f32 %v656_v1, %v656_v1  ;;  %v665_v50 = vmul.f32 %v657_v6, %v657_v6  ;;  %v666_v11 = vmul.f32 %v658_v38, %v658_v38 }
  0x7b   : > { %v667_v4 = vsel %vm309_vm0, %v659_v62, 0.0  ;;  %v668_v49 = vsel %vm309_vm0, %v660_v48, 0.0  ;;  %v670_v18 = vsel %vm309_vm0, %v661_v63, 0.0  ;;  %v672_v54 = vsel %vm309_vm0, %v662_v2, 0.0 }
  0x7c   : > { %v669_v5 = vadd.f32 %v668_v49, %v667_v4  ;;  %v674_v7 = vsel %vm309_vm0, %v663_v8, 0.0  ;;  %v676_v12 = vsel %vm309_vm0, %v664_v9, 0.0  ;;  %v678_v13 = vsel %vm309_vm0, %v665_v50, 0.0 }
  0x7d   : > { %v680_v15 = vsel %vm309_vm0, %v666_v11, 0.0 }
  0x7e   : > { %v671_v42 = vadd.f32 %v670_v18, %v669_v5 }
  0x80   : > { %v673_v0 = vadd.f32 %v672_v54, %v671_v42 }
  0x82   : > { %v675_v10 = vadd.f32 %v674_v7, %v673_v0 }
  0x84   : > { %v677_v53 = vadd.f32 %v676_v12, %v675_v10 }
  0x86   : > { %v679_v14 = vadd.f32 %v678_v13, %v677_v53 }
  0x88   : > { %v681_v16 = vadd.f32 %v680_v15, %v679_v14 }
  0x8a   : > { %v682_v17 = vrot.slane %v681_v16, 4 }
  0x8c   : > { %v683_v3 = vadd.f32 %v682_v17, %v681_v16 }
  0x8e   : > { %v684_v19 = vrot.slane %v683_v3, 2 }
  0x90   : > { %v685_v20 = vadd.f32 %v684_v19, %v683_v3 }
  0x92   : > { %v686_v21 = vrot.slane %v685_v20, 1 }
  0x94   : > { %v687_v33 = vadd.f32 %v686_v21, %v685_v20 }
  0x96   : > { %v689_v24 = vsel %vm688_vm2, %v650_v22, %v687_v33 }
  0x97   : > { %691 = vst.msk [vmem:[%s262_s11] sm:$0x3] %vm690_vm3, %v689_v24 }
  0x98 PF: > { %s17_s21 = sadd.s32 1, %s853_s21  }
  0x99   : > { %p14_p4 = scmp.ge.s32.totalorder %s17_s21, 4  }
  0x9b   :  { %16 = sbr.rel (!%p14_p4) target bundleno = 1 (0x1), region = 93 }

// kernel: convmixer_forward.8
= control target key start
LH: loop header
LB: loop body
LE: loop exit
PB: predicated region body
PF: predicated region fallthrough
CT: control target
= control target key end

     0   :  { %vm235_vm0 = vcmask 261120   ;;  %vm501_vm1 = vcmask 257024   ;;  %vm626_vm2 = vcmask 1040384   ;;  %vm628_vm3 = vcmask 254976   ;;  %s1284_s6 = inlined_call_operand.vmem [shape: bf16[32,32], index: 6, kind: input, shape index: {}]   ;;  %s1285_s0 = inlined_call_operand.vmem [shape: bf16[128,32], index: 0, kind: input, shape index: {}]   ;;  %s1286_s1 = inlined_call_operand.vmem [shape: f32[1,32], index: 1, kind: input, shape index: {}]   ;;  %s1287_s2 = inlined_call_operand.vmem [shape: f32[1,32], index: 2, kind: input, shape index: {}]   ;;  %s1288_s3 = inlined_call_operand.vmem [shape: bf16[128,32], index: 3, kind: input, shape index: {}]   ;;  %s1289_s4 = inlined_call_operand.vmem [shape: f32[1,32], index: 4, kind: input, shape index: {}]   ;;  %s1290_s5 = inlined_call_operand.vmem [shape: f32[1,32], index: 5, kind: input, shape index: {}]   ;;  %s1291_s7 = inlined_call_operand.vmem [shape: f32[1,32], index: 7, kind: input, shape index: {}]   ;;  %s1292_s8 = inlined_call_operand.vmem [shape: bf16[128,32], index: 8, kind: output, shape index: {0}]   ;;  %s1293_s9 = inlined_call_operand.vmem [shape: f32[1,2,32], index: 9, kind: output, shape index: {1}]  }
   0x1   :  { %v797_v0 = vld [vmem:[%s1284_s6 + $0x8] sm:$0xff]   ;;  %v798_v1 = vld [vmem:[%s1284_s6] sm:$0xff]   ;;  %v750_v50 = vld [vmem:[%s1285_s0 + $0x10] sm:$0xff]  }
   0x2   :  { %773 = vmatprep.subr.bf16.mxu0 %v797_v0  ;;  %793 = vmatprep.subr.bf16.mxu1 %v797_v0  ;;  %v686_v2 = vld [vmem:[%s1285_s0] sm:$0xff]   ;;  %v749_v13 = vld [vmem:[%s1285_s0 + $0x8] sm:$0xff]   ;;  %v695_v62 = vunpack.c.l.bf16 %v750_v50  ;;  %v757_v63 = vld [vmem:[%s1288_s3 + $0x10] sm:$0xff]  }
   0x3   :  { %v893_v3 = vld [vmem:[%s1286_s1] ss:$0 sm:$0xff]  ;;  %774 = vmatpush3.bf16.msra.mxu0 %v797_v0  ;;  %795 = vmatpush3.bf16.msra.mxu1 %v797_v0  ;;  %v687_v4 = vunpack.c.l.bf16 %v686_v2  ;;  %v688_v5 = vunpack.c.h.bf16 %v686_v2  ;;  %v691_v26 = vunpack.c.l.bf16 %v749_v13  ;;  %v756_v31 = vld [vmem:[%s1288_s3 + $0x8] sm:$0xff]   ;;  %v692_v34 = vunpack.c.h.bf16 %v749_v13 }
   0x4   :  { %v898_v6 = vld [vmem:[%s1287_s2] ss:$0 sm:$0xff]  ;;  %775 = vmatprep.subr.bf16.mxu0 %v798_v1  ;;  %794 = vmatprep.subr.bf16.mxu1 %v798_v1  ;;  %v753_v36 = vld [vmem:[%s1285_s0 + $0x28] sm:$0xff]   ;;  %v723_v44 = vunpack.c.l.bf16 %v756_v31  ;;  %v724_v48 = vunpack.c.h.bf16 %v756_v31 }
   0x5   :  { %v718_v7 = vld [vmem:[%s1288_s3] sm:$0xff]   ;;  %v71_v14 = vmul.f32 %v687_v4, %v893_v3  ;;  %v72_v15 = vmul.f32 %v688_v5, %v893_v3  ;;  %v73_v35 = vmul.f32 %v691_v26, %v893_v3  ;;  %v74_v42 = vmul.f32 %v692_v34, %v893_v3  ;;  %v760_v45 = vld [vmem:[%s1288_s3 + $0x28] sm:$0xff]   ;;  %v754_v5 = vld [vmem:[%s1285_s0 + $0x30] sm:$0xff]  }
   0x6   :  { %v906_v8 = vld [vmem:[%s1289_s4] ss:$0 sm:$0xff]  ;;  %v719_v9 = vunpack.c.l.bf16 %v718_v7  ;;  %v720_v10 = vunpack.c.h.bf16 %v718_v7  ;;  %v707_v49 = vunpack.c.l.bf16 %v753_v36  ;;  %v708_v54 = vunpack.c.h.bf16 %v753_v36  ;;  %v751_v26 = vld [vmem:[%s1285_s0 + $0x18] sm:$0xff]  }
   0x7   :  { %v752_v11 = vld [vmem:[%s1285_s0 + $0x20] sm:$0xff]   ;;  %776 = vmatpush3.bf16.msra.mxu0 %v798_v1  ;;  %796 = vmatpush3.bf16.msra.mxu1 %v798_v1  ;;  %v94_v23 = vadd.f32 %v898_v6, %v71_v14  ;;  %v95_v24 = vadd.f32 %v898_v6, %v72_v15  ;;  %v96_v43 = vadd.f32 %v898_v6, %v73_v35  ;;  %v739_v57 = vunpack.c.l.bf16 %v760_v45  ;;  %v758_v35 = vld [vmem:[%s1288_s3 + $0x18] sm:$0xff]  }
   0x8   :  { %v759_v12 = vld [vmem:[%s1288_s3 + $0x20] sm:$0xff]   ;;  %v703_v17 = vunpack.c.l.bf16 %v752_v11  ;;  %v704_v18 = vunpack.c.h.bf16 %v752_v11  ;;  %v149_v19 = vmul.f32 %v719_v9, %v906_v8  ;;  %v150_v20 = vmul.f32 %v720_v10, %v906_v8 }
   0x9   :  { %v922_v16 = vld [vmem:[%s1290_s5] ss:$0 sm:$0xff]  ;;  %v735_v21 = vunpack.c.l.bf16 %v759_v12  ;;  %v736_v22 = vunpack.c.h.bf16 %v759_v12  ;;  %v97_v52 = vadd.f32 %v898_v6, %v74_v42  ;;  %v151_v53 = vmul.f32 %v723_v44, %v906_v8  ;;  %v755_v44 = vld [vmem:[%s1285_s0 + $0x38] sm:$0xff]  }
   0xa   :  { %v79_v25 = vmul.f32 %v703_v17, %v893_v3  ;;  %v172_v27 = vadd.f32 %v922_v16, %v149_v19  ;;  %v173_v28 = vadd.f32 %v922_v16, %v150_v20  ;;  %v80_v29 = vmul.f32 %v704_v18, %v893_v3 }
   0xb   :  { %v157_v30 = vmul.f32 %v735_v21, %v906_v8  ;;  %v158_v33 = vmul.f32 %v736_v22, %v906_v8  ;;  %v152_v55 = vmul.f32 %v724_v48, %v906_v8  ;;  %v81_v56 = vmul.f32 %v707_v49, %v893_v3  ;;  %v761_v21 = vld [vmem:[%s1288_s3 + $0x30] sm:$0xff]  }
   0xc   :  { %v102_v32 = vadd.f32 %v898_v6, %v79_v25  ;;  %v188_v37 = vadd.f32 %v172_v27, %v94_v23  ;;  %v189_v38 = vadd.f32 %v173_v28, %v95_v24  ;;  %v103_v39 = vadd.f32 %v898_v6, %v80_v29 }
   0xd   :  { %v180_v40 = vadd.f32 %v922_v16, %v157_v30  ;;  %v181_v41 = vadd.f32 %v922_v16, %v158_v33  ;;  %v740_v58 = vunpack.c.h.bf16 %v760_v45  ;;  %v174_v60 = vadd.f32 %v922_v16, %v151_v53  ;;  %v762_v53 = vld [vmem:[%s1288_s3 + $0x38] sm:$0xff]  }
   0xe   :  { %v204_v46 = vpack.c.bf16 %v189_v38, %v188_v37  ;;  %v82_v61 = vmul.f32 %v708_v54, %v893_v3  ;;  %v175_v0 = vadd.f32 %v922_v16, %v152_v55  ;;  %v104_v1 = vadd.f32 %v898_v6, %v81_v56 }
   0xf   :  { %v196_v47 = vadd.f32 %v180_v40, %v102_v32  ;;  %v197_v51 = vadd.f32 %v181_v41, %v103_v39  ;;  %v159_v2 = vmul.f32 %v739_v57, %v906_v8  ;;  %v160_v4 = vmul.f32 %v740_v58, %v906_v8 }
  0x10   :  { %777 = vmatprep.mubr.msk.bf16.mxu0 %vm235_vm0, %v204_v46  ;;  %v190_v7 = vadd.f32 %v174_v60, %v96_v43  ;;  %v105_v9 = vadd.f32 %v898_v6, %v82_v61  ;;  %v696_v10 = vunpack.c.h.bf16 %v750_v50  ;;  %v75_v11 = vmul.f32 %v695_v62, %v893_v3 }
  0x11   :  { %v208_v59 = vpack.c.bf16 %v197_v51, %v196_v47  ;;  %v191_v12 = vadd.f32 %v175_v0, %v97_v52  ;;  %v182_v13 = vadd.f32 %v922_v16, %v159_v2  ;;  %v183_v14 = vadd.f32 %v922_v16, %v160_v4 }
  0x12   :  { %v727_v15 = vunpack.c.l.bf16 %v757_v63  ;;  %v76_v17 = vmul.f32 %v696_v10, %v893_v3  ;;  %v98_v18 = vadd.f32 %v898_v6, %v75_v11  ;;  %v728_v19 = vunpack.c.h.bf16 %v757_v63 }
  0x13   :  { %785 = vmatprep.mubr.msk.bf16.mxu1 %vm235_vm0, %v208_v59  ;;  %v711_v20 = vunpack.c.l.bf16 %v754_v5  ;;  %v205_v22 = vpack.c.bf16 %v191_v12, %v190_v7  ;;  %v198_v23 = vadd.f32 %v182_v13, %v104_v1  ;;  %v199_v24 = vadd.f32 %v183_v14, %v105_v9 }
  0x14   :  { %v153_v25 = vmul.f32 %v727_v15, %v906_v8  ;;  %v99_v27 = vadd.f32 %v898_v6, %v76_v17  ;;  %v154_v28 = vmul.f32 %v728_v19, %v906_v8  ;;  %v712_v29 = vunpack.c.h.bf16 %v754_v5 }
  0x15   :  { %v83_v30 = vmul.f32 %v711_v20, %v893_v3  ;;  %778 = vmatmul.mubr.msk.bf16.vlgmr.msra.gmra.mxu0 %vm235_vm0, %v205_v22  ;;  %v209_v31 = vpack.c.bf16 %v199_v24, %v198_v23  ;;  %v743_v33 = vunpack.c.l.bf16 %v761_v21  ;;  %v744_v34 = vunpack.c.h.bf16 %v761_v21  ;;  %v1030_v21 = vld [vmem:[%s1291_s7] ss:$0 sm:$0xff] }
  0x16   :  { %v176_v32 = vadd.f32 %v922_v16, %v153_v25  ;;  %v177_v36 = vadd.f32 %v922_v16, %v154_v28  ;;  %v84_v37 = vmul.f32 %v712_v29, %v893_v3  ;;  %v699_v39 = vunpack.c.l.bf16 %v751_v26 }
  0x17   :  { %v106_v38 = vadd.f32 %v898_v6, %v83_v30  ;;  %786 = vmatmul.mubr.msk.bf16.vlgmr.msra.gmra.mxu1 %vm235_vm0, %v209_v31  ;;  %v161_v41 = vmul.f32 %v743_v33, %v906_v8  ;;  %v162_v42 = vmul.f32 %v744_v34, %v906_v8  ;;  %v700_v43 = vunpack.c.h.bf16 %v751_v26 }
  0x18   :  { %v192_v40 = vadd.f32 %v176_v32, %v98_v18  ;;  %v193_v45 = vadd.f32 %v177_v36, %v99_v27  ;;  %v107_v46 = vadd.f32 %v898_v6, %v84_v37  ;;  %v77_v47 = vmul.f32 %v699_v39, %v893_v3 }
  0x19   :  { %v731_v48 = vunpack.c.l.bf16 %v758_v35  ;;  %v184_v49 = vadd.f32 %v922_v16, %v161_v41  ;;  %v185_v50 = vadd.f32 %v922_v16, %v162_v42  ;;  %v78_v51 = vmul.f32 %v700_v43, %v893_v3 }
  0x1a   :  { %v732_v52 = vunpack.c.h.bf16 %v758_v35  ;;  %v206_v54 = vpack.c.bf16 %v193_v45, %v192_v40  ;;  %v100_v55 = vadd.f32 %v898_v6, %v77_v47  ;;  %v715_v57 = vunpack.c.l.bf16 %v755_v44 }
  0x1b   :  { %v155_v56 = vmul.f32 %v731_v48, %v906_v8  ;;  %v200_v58 = vadd.f32 %v184_v49, %v106_v38  ;;  %v201_v59 = vadd.f32 %v185_v50, %v107_v46  ;;  %v101_v60 = vadd.f32 %v898_v6, %v78_v51 }
  0x1c   :  { %v156_v61 = vmul.f32 %v732_v52, %v906_v8  ;;  %781 = vmatprep.mubr.msk.bf16.mxu0 %vm235_vm0, %v206_v54  ;;  %v716_v63 = vunpack.c.h.bf16 %v755_v44  ;;  %v85_v0 = vmul.f32 %v715_v57, %v893_v3  ;;  %v747_v1 = vunpack.c.l.bf16 %v762_v53 }
  0x1d   :  { %v178_v62 = vadd.f32 %v922_v16, %v155_v56  ;;  %v210_v2 = vpack.c.bf16 %v201_v59, %v200_v58  ;;  %v748_v5 = vunpack.c.h.bf16 %v762_v53 }
  0x1e   :  { %v179_v4 = vadd.f32 %v922_v16, %v156_v61  ;;  %v86_v9 = vmul.f32 %v716_v63, %v893_v3  ;;  %v108_v10 = vadd.f32 %v898_v6, %v85_v0  ;;  %v163_v11 = vmul.f32 %v747_v1, %v906_v8 }
  0x1f   :  { %v194_v7 = vadd.f32 %v178_v62, %v100_v55  ;;  %789 = vmatprep.mubr.msk.bf16.mxu1 %vm235_vm0, %v210_v2  ;;  %v164_v13 = vmul.f32 %v748_v5, %v906_v8 }
  0x20   :  { %v195_v12 = vadd.f32 %v179_v4, %v101_v60  ;;  %v109_v14 = vadd.f32 %v898_v6, %v86_v9  ;;  %v186_v15 = vadd.f32 %v922_v16, %v163_v11 }
  0x21   :  { %v187_v18 = vadd.f32 %v922_v16, %v164_v13 }
  0x22   :  { %v207_v17 = vpack.c.bf16 %v195_v12, %v194_v7  ;;  %v202_v19 = vadd.f32 %v186_v15, %v108_v10 }
  0x23   :  { %v203_v3 = vadd.f32 %v187_v18, %v109_v14 }
  0x24   :  { %782 = vmatmul.mubr.msk.bf16.gmra.mxu0 %vm235_vm0, %v207_v17 }
  0x25   :  { %v211_v20 = vpack.c.bf16 %v203_v3, %v202_v19 }
  0x27   :  { %790 = vmatmul.mubr.msk.bf16.gmra.mxu1 %vm235_vm0, %v211_v20 }
  0xd5   :  { %v779_v8 = vpop.f32.mrf.mxu0 }
  0xd6   :  { %v303_v6 = vadd.f32 %v779_v8, %v1030_v21 }
  0xd7   :  { %v787_v22 = vpop.f32.mrf.mxu1  ;;  %v294_v23 = vpop.f32.mrf.mxu0 }
  0xd8   :  { %v375_v24 = vmul.f32 0.70710677, %v303_v6  ;;  %v335_v16 = vadd.f32 %v787_v22, %v1030_v21  ;;  %v295_v25 = vadd.f32 %v1030_v21, %v294_v23  ;;  %v359_v49 = vmul.f32 0.5, %v303_v6 }
  0xd9   :  { %v326_v26 = vpop.f32.mrf.mxu1  ;;  %v780_v27 = vpop.f32.mrf.mxu0 }
  0xda   :  { %799 = verf.f32 %v375_v24  ;;  %v383_v28 = vmul.f32 0.70710677, %v335_v16  ;;  %v373_v29 = vmul.f32 0.70710677, %v295_v25  ;;  %v327_v30 = vadd.f32 %v1030_v21, %v326_v26 }
  0xdb   :  { %v306_v31 = vadd.f32 %v780_v27, %v1030_v21  ;;  %v788_v32 = vpop.f32.mrf.mxu1  ;;  %v297_v33 = vpop.f32.mrf.mxu0  ;;  %v367_v53 = vmul.f32 0.5, %v335_v16  ;;  %v357_v63 = vmul.f32 0.5, %v295_v25 }
  0xdc   :  { %801 = verf.f32 %v383_v28  ;;  %v338_v34 = vadd.f32 %v788_v32, %v1030_v21  ;;  %v298_v35 = vadd.f32 %v1030_v21, %v297_v33  ;;  %v381_v36 = vmul.f32 0.70710677, %v327_v30 }
  0xdd   :  { %803 = verf.f32 %v373_v29  ;;  %v329_v37 = vpop.f32.mrf.mxu1  ;;  %v376_v38 = vmul.f32 0.70710677, %v306_v31  ;;  %v365_v7 = vmul.f32 0.5, %v327_v30  ;;  %v360_v12 = vmul.f32 0.5, %v306_v31 }
  0xde   :  { %v384_v39 = vmul.f32 0.70710677, %v338_v34  ;;  %805 = verf.f32 %v381_v36  ;;  %v374_v40 = vmul.f32 0.70710677, %v298_v35  ;;  %v1040_v41 = vadd.f32 %v1030_v21, %v329_v37 }
  0xdf   :  { %807 = verf.f32 %v376_v38  ;;  %v368_v19 = vmul.f32 0.5, %v338_v34  ;;  %v358_v23 = vmul.f32 0.5, %v298_v35 }
  0xe0   :  { %809 = verf.f32 %v384_v39  ;;  %v382_v42 = vmul.f32 0.70710677, %v1040_v41  ;;  %v366_v29 = vmul.f32 0.5, %v1040_v41 }
  0xe1   :  { %811 = verf.f32 %v374_v40 }
  0xe2   :  { %813 = verf.f32 %v382_v42 }
  0xe4   :  { %v783_v43 = vpop.f32.mrf.mxu0 }
  0xe5   :  { %v1044_v44 = vadd.f32 %v783_v43, %v1030_v21 }
  0xe6   :  { %v310_v45 = vpop.f32.mrf.mxu0 }
  0xe7   :  { %v379_v46 = vmul.f32 0.70710677, %v1044_v44  ;;  %v1048_v47 = vadd.f32 %v1030_v21, %v310_v45  ;;  %v800_v48 = vpop.eup %799  ;;  %v791_v50 = vpop.f32.mrf.mxu1  ;;  %v363_v43 = vmul.f32 0.5, %v1044_v44 }
  0xe8   :  { %v784_v51 = vpop.f32.mrf.mxu0  ;;  %v407_v52 = vadd.f32 1.0, %v800_v48  ;;  %v1051_v54 = vadd.f32 %v791_v50, %v1030_v21 }
  0xe9   :  { %815 = verf.f32 %v379_v46  ;;  %v802_v55 = vpop.eup %801  ;;  %v377_v56 = vmul.f32 0.70710677, %v1048_v47  ;;  %v342_v57 = vpop.f32.mrf.mxu1  ;;  %v1058_v62 = vadd.f32 %v784_v51, %v1030_v21  ;;  %v361_v44 = vmul.f32 0.5, %v1048_v47 }
  0xea   :  { %v804_v58 = vpop.eup %803  ;;  %v1054_v59 = vmul.f32 %v407_v52, %v359_v49  ;;  %v415_v60 = vadd.f32 1.0, %v802_v55  ;;  %v387_v61 = vmul.f32 0.70710677, %v1051_v54  ;;  %v1061_v1 = vadd.f32 %v1030_v21, %v342_v57  ;;  %v313_v31 = vpop.f32.mrf.mxu0 }
  0xeb   :  { %v405_v0 = vadd.f32 1.0, %v804_v58  ;;  %817 = verf.f32 %v377_v56  ;;  %v806_v2 = vpop.eup %805  ;;  %v792_v14 = vpop.f32.mrf.mxu1  ;;  %v380_v3 = vmul.f32 0.70710677, %v1058_v62  ;;  %v314_v39 = vadd.f32 %v1030_v21, %v313_v31 }
  0xec   :  { %v671_v4 = vpack.c.bf16 %v1054_v59, %v1054_v59  ;;  %v1065_v5 = vmul.f32 %v415_v60, %v367_v53  ;;  %819 = verf.f32 %v387_v61  ;;  %v808_v9 = vpop.eup %807  ;;  %v413_v11 = vadd.f32 1.0, %v806_v2 }
  0xed   :  { %v1067_v10 = vmul.f32 %v405_v0, %v357_v63  ;;  %v385_v13 = vmul.f32 0.70710677, %v1061_v1  ;;  %v810_v15 = vpop.eup %809  ;;  %v408_v18 = vadd.f32 1.0, %v808_v9  ;;  %v1088_v26 = vadd.f32 %v792_v14, %v1030_v21  ;;  %v345_v34 = vpop.f32.mrf.mxu1 }
  0xee   :  { %504 = vst.msk [vmem:[%s1292_s8 + $0x8] sm:$0xf] %vm501_vm1, %v671_v4  ;;  %v679_v17 = vpack.c.bf16 %v1065_v5, %v1065_v5  ;;  %v812_v20 = vpop.eup %811  ;;  %v1079_v6 = vmul.f32 %v413_v11, %v365_v7  ;;  %v416_v22 = vadd.f32 1.0, %v810_v15  ;;  %v346_v42 = vadd.f32 %v1030_v21, %v345_v34 }
  0xef   :  { %v669_v8 = vpack.c.bf16 %v1067_v10, %v1067_v10  ;;  %v814_v24 = vpop.eup %813  ;;  %v1085_v16 = vmul.f32 %v408_v18, %v360_v12  ;;  %v406_v25 = vadd.f32 1.0, %v812_v20  ;;  %821 = verf.f32 %v385_v13 }
  0xf0   :  { %512 = vst.msk [vmem:[%s1292_s8 + $0x28] sm:$0xf] %vm501_vm1, %v679_v17  ;;  %v677_v27 = vpack.c.bf16 %v1079_v6, %v1079_v6  ;;  %v1096_v28 = vmul.f32 %v416_v22, %v368_v19  ;;  %v414_v30 = vadd.f32 1.0, %v814_v24  ;;  %823 = verf.f32 %v380_v3 }
  0xf1   :  { %502 = vst.msk [vmem:[%s1292_s8] sm:$0xf] %vm501_vm1, %v669_v8  ;;  %v672_v32 = vpack.c.bf16 %v1085_v16, %v1085_v16  ;;  %v1101_v33 = vmul.f32 %v406_v25, %v358_v23  ;;  %v388_v38 = vmul.f32 0.70710677, %v1088_v26  ;;  %v378_v46 = vmul.f32 0.70710677, %v314_v39 }
  0xf2   :  { %510 = vst.msk [vmem:[%s1292_s8 + $0x20] sm:$0xf] %vm501_vm1, %v677_v27  ;;  %v680_v35 = vpack.c.bf16 %v1096_v28, %v1096_v28  ;;  %v1109_v36 = vmul.f32 %v414_v30, %v366_v29  ;;  %v386_v48 = vmul.f32 0.70710677, %v346_v42  ;;  %v371_v51 = vmul.f32 0.5, %v1051_v54 }
  0xf3   :  { %505 = vst.msk [vmem:[%s1292_s8 + $0xc] sm:$0xf] %vm501_vm1, %v672_v32  ;;  %v670_v37 = vpack.c.bf16 %v1101_v33, %v1101_v33  ;;  %825 = verf.f32 %v388_v38  ;;  %v519_v21 = vsel %vm235_vm0, %v1101_v33, 0.0  ;;  %v518_v55 = vsel %vm235_vm0, %v1067_v10, 0.0 }
  0xf4   :  { %513 = vst.msk [vmem:[%s1292_s8 + $0x2c] sm:$0xf] %vm501_vm1, %v680_v35  ;;  %v678_v41 = vpack.c.bf16 %v1109_v36, %v1109_v36  ;;  %827 = verf.f32 %v378_v46  ;;  %v520_v58 = vadd.f32 %v519_v21, %v518_v55  ;;  %v521_v63 = vsel %vm235_vm0, %v1054_v59, 0.0 }
  0xf5   :  { %503 = vst.msk [vmem:[%s1292_s8 + $0x4] sm:$0xf] %vm501_vm1, %v670_v37  ;;  %829 = verf.f32 %v386_v48  ;;  %v369_v2 = vmul.f32 0.5, %v1061_v1  ;;  %v364_v12 = vmul.f32 0.5, %v1058_v62  ;;  %v523_v1 = vsel %vm235_vm0, %v1085_v16, 0.0 }
  0xf6   :  { %v816_v40 = vpop.eup %815  ;;  %511 = vst.msk [vmem:[%s1292_s8 + $0x24] sm:$0xf] %vm501_vm1, %v678_v41  ;;  %v522_v9 = vadd.f32 %v521_v63, %v520_v58  ;;  %v372_v62 = vmul.f32 0.5, %v1088_v26  ;;  %v362_v24 = vmul.f32 0.5, %v314_v39  ;;  %v370_v29 = vmul.f32 0.5, %v346_v42 }
  0xf7   :  { %v411_v45 = vadd.f32 1.0, %v816_v40  ;;  %v535_v46 = vsel %vm235_vm0, %v1109_v36, 0.0 }
  0xf8   :  { %v818_v49 = vpop.eup %817  ;;  %v524_v18 = vadd.f32 %v523_v1, %v522_v9 }
  0xf9   :  { %v1137_v50 = vmul.f32 %v411_v45, %v363_v43  ;;  %v820_v52 = vpop.eup %819  ;;  %v409_v53 = vadd.f32 1.0, %v818_v49  ;;  %v533_v43 = vsel %vm235_vm0, %v1079_v6, 0.0  ;;  %v537_v49 = vsel %vm235_vm0, %v1065_v5, 0.0 }
  0xfa   :  { %v419_v57 = vadd.f32 1.0, %v820_v52 }
  0xfb   :  { %v675_v56 = vpack.c.bf16 %v1137_v50, %v1137_v50  ;;  %v1145_v60 = vmul.f32 %v409_v53, %v361_v44  ;;  %v529_v39 = vsel %vm235_vm0, %v1137_v50, 0.0 }
  0xfc   :  { %v1151_v54 = vmul.f32 %v419_v57, %v371_v51  ;;  %v822_v47 = vpop.eup %821  ;;  %v539_v51 = vsel %vm235_vm0, %v1096_v28, 0.0 }
  0xfd   :  { %508 = vst.msk [vmem:[%s1292_s8 + $0x18] sm:$0xf] %vm501_vm1, %v675_v56  ;;  %v673_v61 = vpack.c.bf16 %v1145_v60, %v1145_v60  ;;  %v417_v4 = vadd.f32 1.0, %v822_v47  ;;  %v824_v7 = vpop.eup %823  ;;  %v525_v22 = vsel %vm235_vm0, %v1145_v60, 0.0 }
  0xfe   :  { %v683_v0 = vpack.c.bf16 %v1151_v54, %v1151_v54  ;;  %v412_v13 = vadd.f32 1.0, %v824_v7  ;;  %v526_v27 = vadd.f32 %v525_v22, %v524_v18  ;;  %v545_v57 = vsel %vm235_vm0, %v1151_v54, 0.0 }
  0xff   :  { %506 = vst.msk [vmem:[%s1292_s8 + $0x10] sm:$0xf] %vm501_vm1, %v673_v61  ;;  %v1168_v11 = vmul.f32 %v417_v4, %v369_v2 }
 0x100   :  { %516 = vst.msk [vmem:[%s1292_s8 + $0x38] sm:$0xf] %vm501_vm1, %v683_v0  ;;  %v1175_v15 = vmul.f32 %v412_v13, %v364_v12  ;;  %v826_v17 = vpop.eup %825 }
 0x101   :  { %v681_v14 = vpack.c.bf16 %v1168_v11, %v1168_v11  ;;  %v420_v3 = vadd.f32 1.0, %v826_v17  ;;  %v828_v20 = vpop.eup %827  ;;  %v541_v44 = vsel %vm235_vm0, %v1168_v11, 0.0 }
 0x102   :  { %v676_v19 = vpack.c.bf16 %v1175_v15, %v1175_v15  ;;  %v830_v8 = vpop.eup %829  ;;  %v410_v25 = vadd.f32 1.0, %v828_v20  ;;  %v531_v41 = vsel %vm235_vm0, %v1175_v15, 0.0 }
 0x103   :  { %514 = vst.msk [vmem:[%s1292_s8 + $0x30] sm:$0xf] %vm501_vm1, %v681_v14  ;;  %v1190_v23 = vmul.f32 %v420_v3, %v372_v62  ;;  %v418_v30 = vadd.f32 1.0, %v830_v8 }
 0x104   :  { %509 = vst.msk [vmem:[%s1292_s8 + $0x1c] sm:$0xf] %vm501_vm1, %v676_v19  ;;  %v426_v31 = vmul.f32 %v410_v25, %v362_v24 }
 0x105   :  { %v684_v26 = vpack.c.bf16 %v1190_v23, %v1190_v23  ;;  %v1194_v32 = vmul.f32 %v418_v30, %v370_v29  ;;  %v547_v47 = vsel %vm235_vm0, %v1190_v23, 0.0 }
 0x106   :  { %v674_v34 = vpack.c.bf16 %v426_v31, %v426_v31  ;;  %v527_v35 = vsel %vm235_vm0, %v426_v31, 0.0 }
 0x107   :  { %517 = vst.msk [vmem:[%s1292_s8 + $0x3c] sm:$0xf] %vm501_vm1, %v684_v26  ;;  %v528_v37 = vadd.f32 %v527_v35, %v526_v27  ;;  %v682_v38 = vpack.c.bf16 %v1194_v32, %v1194_v32  ;;  %v543_v55 = vsel %vm235_vm0, %v1194_v32, 0.0 }
 0x108   :  { %507 = vst.msk [vmem:[%s1292_s8 + $0x14] sm:$0xf] %vm501_vm1, %v674_v34 }
 0x109   :  { %v530_v40 = vadd.f32 %v529_v39, %v528_v37  ;;  %515 = vst.msk [vmem:[%s1292_s8 + $0x34] sm:$0xf] %vm501_vm1, %v682_v38 }
 0x10b   :  { %v532_v42 = vadd.f32 %v531_v41, %v530_v40 }
 0x10d   :  { %v534_v45 = vadd.f32 %v533_v43, %v532_v42 }
 0x10f   :  { %v536_v48 = vadd.f32 %v535_v46, %v534_v45 }
 0x111   :  { %v538_v21 = vadd.f32 %v537_v49, %v536_v48 }
 0x113   :  { %v540_v52 = vadd.f32 %v539_v51, %v538_v21 }
 0x115   :  { %v542_v53 = vadd.f32 %v541_v44, %v540_v52 }
 0x117   :  { %v544_v56 = vadd.f32 %v543_v55, %v542_v53 }
 0x119   :  { %v546_v58 = vadd.f32 %v545_v57, %v544_v56 }
 0x11b   :  { %v548_v61 = vadd.f32 %v547_v47, %v546_v58 }
 0x11d   :  { %v549_v63 = vrot.slane %v548_v61, 4 }
 0x11f   :  { %v550_v0 = vadd.f32 %v549_v63, %v548_v61 }
 0x121   :  { %v551_v2 = vrot.slane %v550_v0, 2 }
 0x123   :  { %v552_v4 = vadd.f32 %v551_v2, %v550_v0 }
 0x125   :  { %v553_v7 = vrot.slane %v552_v4, 1 }
 0x127   :  { %v554_v9 = vadd.f32 %v553_v7, %v552_v4 }
 0x129   :  { %v1231_v12 = vmul.f32 0.0078125, %v554_v9 }
 0x12b   :  { %v557_v13 = vsub.f32 %v1067_v10, %v1231_v12  ;;  %v558_v1 = vsub.f32 %v1101_v33, %v1231_v12  ;;  %v559_v14 = vsub.f32 %v1054_v59, %v1231_v12  ;;  %v560_v17 = vsub.f32 %v1085_v16, %v1231_v12 }
 0x12c   :  { %v561_v62 = vsub.f32 %v1145_v60, %v1231_v12  ;;  %v562_v20 = vsub.f32 %v426_v31, %v1231_v12  ;;  %v563_v59 = vsub.f32 %v1137_v50, %v1231_v12  ;;  %v564_v27 = vsub.f32 %v1175_v15, %v1231_v12 }
 0x12d   :  { %v573_v18 = vmul.f32 %v557_v13, %v557_v13  ;;  %v574_v19 = vmul.f32 %v558_v1, %v558_v1  ;;  %v575_v3 = vmul.f32 %v559_v14, %v559_v14  ;;  %v576_v8 = vmul.f32 %v560_v17, %v560_v17 }
 0x12e   :  { %v577_v24 = vmul.f32 %v561_v62, %v561_v62  ;;  %v578_v60 = vmul.f32 %v562_v20, %v562_v20  ;;  %v565_v26 = vsub.f32 %v1079_v6, %v1231_v12  ;;  %v579_v31 = vmul.f32 %v563_v59, %v563_v59 }
 0x12f   :  { %v589_v10 = vsel %vm235_vm0, %v573_v18, 0.0  ;;  %v590_v22 = vsel %vm235_vm0, %v574_v19, 0.0  ;;  %v592_v16 = vsel %vm235_vm0, %v575_v3, 0.0  ;;  %v594_v29 = vsel %vm235_vm0, %v576_v8, 0.0 }
 0x130   :  { %v591_v33 = vadd.f32 %v590_v22, %v589_v10  ;;  %v596_v34 = vsel %vm235_vm0, %v577_v24, 0.0  ;;  %v566_v50 = vsub.f32 %v1109_v36, %v1231_v12  ;;  %v580_v37 = vmul.f32 %v564_v27, %v564_v27 }
 0x131   :  { %v598_v38 = vsel %vm235_vm0, %v578_v60, 0.0  ;;  %v567_v15 = vsub.f32 %v1065_v5, %v1231_v12  ;;  %v581_v40 = vmul.f32 %v565_v26, %v565_v26  ;;  %v600_v41 = vsel %vm235_vm0, %v579_v31, 0.0 }
 0x132   :  { %v593_v25 = vadd.f32 %v592_v16, %v591_v33  ;;  %v568_v6 = vsub.f32 %v1096_v28, %v1231_v12  ;;  %v582_v43 = vmul.f32 %v566_v50, %v566_v50  ;;  %v602_v45 = vsel %vm235_vm0, %v580_v37, 0.0 }
 0x133   :  { %v569_v36 = vsub.f32 %v1168_v11, %v1231_v12  ;;  %v583_v48 = vmul.f32 %v567_v15, %v567_v15  ;;  %v604_v49 = vsel %vm235_vm0, %v581_v40, 0.0  ;;  %v570_v5 = vsub.f32 %v1194_v32, %v1231_v12 }
 0x134   :  { %v595_v30 = vadd.f32 %v594_v29, %v593_v25  ;;  %v584_v51 = vmul.f32 %v568_v6, %v568_v6  ;;  %v606_v52 = vsel %vm235_vm0, %v582_v43, 0.0  ;;  %v571_v28 = vsub.f32 %v1151_v54, %v1231_v12 }
 0x135   :  { %v585_v53 = vmul.f32 %v569_v36, %v569_v36  ;;  %v608_v55 = vsel %vm235_vm0, %v583_v48, 0.0  ;;  %v572_v11 = vsub.f32 %v1190_v23, %v1231_v12  ;;  %v586_v57 = vmul.f32 %v570_v5, %v570_v5 }
 0x136   :  { %v597_v35 = vadd.f32 %v596_v34, %v595_v30  ;;  %v610_v58 = vsel %vm235_vm0, %v584_v51, 0.0  ;;  %v587_v61 = vmul.f32 %v571_v28, %v571_v28 }
 0x137   :  { %v612_v32 = vsel %vm235_vm0, %v585_v53, 0.0  ;;  %v588_v0 = vmul.f32 %v572_v11, %v572_v11  ;;  %v614_v2 = vsel %vm235_vm0, %v586_v57, 0.0 }
 0x138   :  { %v599_v39 = vadd.f32 %v598_v38, %v597_v35  ;;  %v616_v54 = vsel %vm235_vm0, %v587_v61, 0.0 }
 0x139   :  { %v618_v9 = vsel %vm235_vm0, %v588_v0, 0.0 }
 0x13a   :  { %v601_v42 = vadd.f32 %v600_v41, %v599_v39 }
 0x13c   :  { %v603_v46 = vadd.f32 %v602_v45, %v601_v42 }
 0x13e   :  { %v605_v21 = vadd.f32 %v604_v49, %v603_v46 }
 0x140   :  { %v607_v44 = vadd.f32 %v606_v52, %v605_v21 }
 0x142   :  { %v609_v56 = vadd.f32 %v608_v55, %v607_v44 }
 0x144   :  { %v611_v47 = vadd.f32 %v610_v58, %v609_v56 }
 0x146   :  { %v613_v63 = vadd.f32 %v612_v32, %v611_v47 }
 0x148   :  { %v615_v4 = vadd.f32 %v614_v2, %v613_v63 }
 0x14a   :  { %v617_v7 = vadd.f32 %v616_v54, %v615_v4 }
 0x14c   :  { %v619_v13 = vadd.f32 %v618_v9, %v617_v7 }
 0x14e   :  { %v620_v1 = vrot.slane %v619_v13, 4 }
 0x150   :  { %v621_v23 = vadd.f32 %v620_v1, %v619_v13 }
 0x152   :  { %v622_v14 = vrot.slane %v621_v23, 2 }
 0x154   :  { %v623_v17 = vadd.f32 %v622_v14, %v621_v23 }
 0x156   :  { %v624_v18 = vrot.slane %v623_v17, 1 }
 0x158   :  { %v625_v19 = vadd.f32 %v624_v18, %v623_v17 }
 0x15a   :  { %v627_v62 = vsel %vm626_vm2, %v1231_v12, %v625_v19 }
 0x15b   :  { %629 = vst.msk [vmem:[%s1293_s9] sm:$0x3] %vm628_vm3, %v627_v62 }

</bundles_post_ra>
